<compile_context>
chip_gen: v7x
topology: tpu7x:2x2x1
jax: 0.10.0
libtpu: 0.0.40
codegen_flags: <defaults>
</compile_context>

<pallas_src>
import functools
import math

import jax
import jax.numpy as jnp
from jax import lax
from jax.experimental import pallas as pl
from jax.experimental.pallas import tpu as pltpu


# ---------------------------------------------------------------------------
# Kernel helpers (traced inside the Pallas body)
# ---------------------------------------------------------------------------
def _layer_norm(x, w, b, eps=1e-5):
    mu = jnp.mean(x, axis=-1, keepdims=True)
    var = jnp.mean((x - mu) ** 2, axis=-1, keepdims=True)
    return (x - mu) * lax.rsqrt(var + eps) * w + b


def _gelu_exact(x):
    # nn.GELU default (approximate='none'): 0.5 * x * (1 + erf(x / sqrt(2)))
    return 0.5 * x * (1.0 + lax.erf(x * (1.0 / math.sqrt(2.0))))


# ---------------------------------------------------------------------------
# Pallas kernel: full residual attention block for one batch tile
# ---------------------------------------------------------------------------
def _resblock_kernel(
    x_ref,                       # (B, L, E) activations, batch-major
    ln1_w_ref, ln1_b_ref,        # (1, E) f32
    w_in_t_ref, b_in_ref,        # (E, 3E) bf16 (q rows pre-scaled), (1, 3E) f32
    w_out_t_ref, b_out_ref,      # (E, E) bf16,  (1, E) f32
    ln2_w_ref, ln2_b_ref,        # (1, E) f32
    w_fc_t_ref, b_fc_ref,        # (E, M) bf16,  (1, M) f32
    w_proj_t_ref, b_proj_ref,    # (M, E) bf16,  (1, E) f32
    o_ref,                       # (B, L, E)
    attn_ref,                    # VMEM scratch (B*L, E) bf16 (head outputs)
    *, n_head: int,
):
    B, L, E = x_ref.shape
    Dh = E // n_head
    T = B * L

    x = x_ref[...].astype(jnp.float32).reshape(T, E)        # (T, E) fp32

    # ---- attention branch: ln_1 -> MHA -> residual -------------------------
    h = _layer_norm(x, ln1_w_ref[0], ln1_b_ref[0]).astype(jnp.bfloat16)
    qkv = (jnp.dot(h, w_in_t_ref[...], preferred_element_type=jnp.float32)
           + b_in_ref[0])                                    # (T, 3E) fp32
    # q scaling (1/sqrt(Dh)) already folded into w_in_t / b_in at prep time.
    q = qkv[:, 0 * E:1 * E].astype(jnp.bfloat16)
    k = qkv[:, 1 * E:2 * E].astype(jnp.bfloat16)
    v = qkv[:, 2 * E:3 * E].astype(jnp.bfloat16)

    # Per-head loop; each head handles the full (B, L) tile via a
    # leading-batch einsum; head outputs go straight into the bf16 VMEM
    # scratch (no jnp.concatenate, no major-dim transpose in-kernel).
    for hh in range(n_head):
        sl = slice(hh * Dh, (hh + 1) * Dh)
        qh = q[:, sl].reshape(B, L, Dh)
        kh = k[:, sl].reshape(B, L, Dh)
        vh = v[:, sl].reshape(B, L, Dh)
        s = jnp.einsum("bqd,bkd->bqk", qh, kh,
                       preferred_element_type=jnp.float32)   # (B, L, L) fp32
        s = s - jnp.max(s, axis=-1, keepdims=True)
        p = jnp.exp(s)
        inv = pl.reciprocal(jnp.sum(p, axis=-1, keepdims=True), approx=True)
        p = (p * inv).astype(jnp.bfloat16)
        oh = jnp.einsum("bqk,bkd->bqd", p, vh,
                        preferred_element_type=jnp.float32)  # (B, L, Dh) fp32
        attn_ref[:, sl] = oh.reshape(T, Dh).astype(jnp.bfloat16)

    attn = (jnp.dot(attn_ref[...], w_out_t_ref[...],
                    preferred_element_type=jnp.float32) + b_out_ref[0])
    x1 = x + attn                 # ls_1 is Identity (ls_init_value=None)

    # ---- MLP branch: ln_2 -> c_fc -> GELU -> c_proj -> residual ------------
    h2 = _layer_norm(x1, ln2_w_ref[0], ln2_b_ref[0]).astype(jnp.bfloat16)
    f = (jnp.dot(h2, w_fc_t_ref[...], preferred_element_type=jnp.float32)
         + b_fc_ref[0])
    f = _gelu_exact(f).astype(jnp.bfloat16)
    f = (jnp.dot(f, w_proj_t_ref[...], preferred_element_type=jnp.float32)
         + b_proj_ref[0])

    o_ref[...] = (x1 + f).reshape(B, L, E).astype(o_ref.dtype)  # ls_2 Identity


# ---------------------------------------------------------------------------
# Wrapper: one-time parameter prep + pallas_call
# ---------------------------------------------------------------------------
def prepare_params(params, n_head):
    """One-time transpose + bf16 cast of the matmul weights, with the q-scale
    (1/sqrt(Dh)) folded into the q portion of the in-projection. Call once,
    outside the per-invocation path."""
    bf16 = jnp.bfloat16
    f32 = jnp.float32
    row = lambda v: v.reshape(1, -1).astype(f32)

    w_in = params["w_in"].astype(f32)      # (3E, E), torch in_proj_weight
    b_in = params["b_in"].astype(f32)      # (3E,)
    E = w_in.shape[1]
    Dh = E // n_head
    scale = 1.0 / math.sqrt(Dh)
    q_scale = jnp.concatenate(
        [jnp.full((E,), scale, f32), jnp.ones((2 * E,), f32)], axis=0)
    w_in = w_in * q_scale[:, None]
    b_in = b_in * q_scale

    return {
        "ln1_w": row(params["ln1_w"]), "ln1_b": row(params["ln1_b"]),
        "w_in_t": w_in.T.astype(bf16), "b_in": row(b_in),
        "w_out_t": params["w_out"].T.astype(bf16), "b_out": row(params["b_out"]),
        "ln2_w": row(params["ln2_w"]), "ln2_b": row(params["ln2_b"]),
        "w_fc_t": params["w_fc"].T.astype(bf16), "b_fc": row(params["b_fc"]),
        "w_proj_t": params["w_proj"].T.astype(bf16), "b_proj": row(params["b_proj"]),
    }


def _pick_batch_tile(n, l, target_rows=256, cap=16):
    """Largest divisor of n (<= cap) such that b_tile*l is near target_rows."""
    limit = min(n, cap, max(1, -(-target_rows // l)))
    for t in range(limit, 0, -1):
        if n % t == 0:
            return t
    return 1


def residual_attention_block(x_lnd, prep, n_head):
    """x_lnd: (L, N, E) float32 (seq-first, torch MHA convention).
    prep: output of prepare_params(). Returns (L, N, E)."""
    L, N, E = x_lnd.shape
    b_tile = _pick_batch_tile(N, L)

    # Single activation transpose to batch-major so attention runs as a
    # leading-batch einsum inside the kernel.
    x = jnp.transpose(x_lnd, (1, 0, 2))      # (N, L, E)

    weight_order = ("ln1_w", "ln1_b", "w_in_t", "b_in", "w_out_t", "b_out",
                    "ln2_w", "ln2_b", "w_fc_t", "b_fc", "w_proj_t", "b_proj")
    w_args = [prep[k] for k in weight_order]

    def full_spec(a):
        # whole (small) parameter array resident in VMEM; constant block index
        # so it is not re-fetched across grid steps.
        nd = a.ndim
        return pl.BlockSpec(a.shape, lambda b, _nd=nd: (0,) * _nd)

    grid_spec = pltpu.PrefetchScalarGridSpec(
        num_scalar_prefetch=0,
        grid=(N // b_tile,),
        in_specs=[pl.BlockSpec((b_tile, L, E), lambda b: (b, 0, 0))]
                 + [full_spec(a) for a in w_args],
        out_specs=pl.BlockSpec((b_tile, L, E), lambda b: (b, 0, 0)),
        scratch_shapes=[pltpu.VMEM((b_tile * L, E), jnp.bfloat16)],
    )

    out = pl.pallas_call(
        functools.partial(_resblock_kernel, n_head=n_head),
        out_shape=jax.ShapeDtypeStruct((N, L, E), x_lnd.dtype),
        grid_spec=grid_spec,
        compiler_params=pltpu.CompilerParams(
            dimension_semantics=("parallel",),
            vmem_limit_bytes=64 * 1024 * 1024,
        ),
    )(x, *w_args)

    return jnp.transpose(out, (1, 0, 2))     # back to (L, N, E)


# ---------------------------------------------------------------------------
# Pure-JAX fp32 reference (mirrors torch semantics) for validation
# ---------------------------------------------------------------------------
def _reference(x_lnd, p, n_head):
    def ln(x, w, b, eps=1e-5):
        mu = x.mean(-1, keepdims=True)
        var = ((x - mu) ** 2).mean(-1, keepdims=True)
        return (x - mu) / jnp.sqrt(var + eps) * w + b

    L, N, E = x_lnd.shape
    Dh = E // n_head
    x = x_lnd
    h = ln(x, p["ln1_w"], p["ln1_b"])
    qkv = h @ p["w_in"].T + p["b_in"]                      # (L, N, 3E)
    q, k, v = jnp.split(qkv, 3, axis=-1)

    def split_heads(t):                                    # (L,N,E) -> (N,H,L,Dh)
        return t.reshape(L, N, n_head, Dh).transpose(1, 2, 0, 3)

    qh, kh, vh = map(split_heads, (q, k, v))
    s = jnp.einsum("nhqd,nhkd->nhqk", qh, kh) / math.sqrt(Dh)
    a = jax.nn.softmax(s, axis=-1)
    o = jnp.einsum("nhqk,nhkd->nhqd", a, vh)               # (N,H,L,Dh)
    o = o.transpose(2, 0, 1, 3).reshape(L, N, E)
    o = o @ p["w_out"].T + p["b_out"]
    x1 = x + o
    h2 = ln(x1, p["ln2_w"], p["ln2_b"])
    f = h2 @ p["w_fc"].T + p["b_fc"]
    f = 0.5 * f * (1.0 + jax.scipy.special.erf(f / jnp.sqrt(2.0)))
    f = f @ p["w_proj"].T + p["b_proj"]
    return x1 + f


# ---------------------------------------------------------------------------
if __name__ == "__main__":
    # Small, module-consistent shapes: seq=8, batch=2, d_model=32, heads=4, mlp=4x
    L, N, E, H = 8, 2, 32, 4
    M = int(E * 4.0)

    key = jax.random.PRNGKey(0)
    ks = jax.random.split(key, 12)

    def rnd(k, shape, scale=0.05):
        return scale * jax.random.normal(k, shape, dtype=jnp.float32)

    params = {
        "ln1_w": 1.0 + rnd(ks[0], (E,)),
        "ln1_b": rnd(ks[1], (E,)),
        "w_in":  rnd(ks[2], (3 * E, E)),   # torch in_proj_weight (3E, E)
        "b_in":  rnd(ks[3], (3 * E,)),
        "w_out": rnd(ks[4], (E, E)),       # torch out_proj.weight (E, E)
        "b_out": rnd(ks[5], (E,)),
        "ln2_w": 1.0 + rnd(ks[6], (E,)),
        "ln2_b": rnd(ks[7], (E,)),
        "w_fc":  rnd(ks[8], (M, E)),       # torch c_fc.weight (M, E)
        "b_fc":  rnd(ks[9], (M,)),
        "w_proj": rnd(ks[10], (E, M)),     # torch c_proj.weight (E, M)
        "b_proj": rnd(ks[11], (E,)),
    }

    prep = prepare_params(params, n_head=H)   # one-time transpose/scale/cast

    q_x = jax.random.normal(jax.random.PRNGKey(42), (L, N, E), dtype=jnp.float32)

    out = residual_attention_block(q_x, prep, n_head=H)
    out = jax.block_until_ready(out)

    ref = _reference(q_x, params, n_head=H)
    assert out.shape == (L, N, E)
    # bf16 matmul operands (fp32 accumulation) => looser tolerance than fp32.
    assert jnp.allclose(out, ref, atol=2e-2, rtol=2e-2), (
        f"max abs err {jnp.max(jnp.abs(out - ref))}")

    print("KERNEL_OK")
</pallas_src>

<mosaic_0001>
module attributes {stable_mosaic.version = 11 : i64} {
  func.func @_resblock_kernel(%arg0: i32, %arg1: memref<2x8x32xf32, #tpu.memory_space<vmem>>, %arg2: memref<1x32xf32, #tpu.memory_space<vmem>>, %arg3: memref<1x32xf32, #tpu.memory_space<vmem>>, %arg4: memref<32x96xbf16, #tpu.memory_space<vmem>>, %arg5: memref<1x96xf32, #tpu.memory_space<vmem>>, %arg6: memref<32x32xbf16, #tpu.memory_space<vmem>>, %arg7: memref<1x32xf32, #tpu.memory_space<vmem>>, %arg8: memref<1x32xf32, #tpu.memory_space<vmem>>, %arg9: memref<1x32xf32, #tpu.memory_space<vmem>>, %arg10: memref<32x128xbf16, #tpu.memory_space<vmem>>, %arg11: memref<1x128xf32, #tpu.memory_space<vmem>>, %arg12: memref<128x32xbf16, #tpu.memory_space<vmem>>, %arg13: memref<1x32xf32, #tpu.memory_space<vmem>>, %arg14: memref<2x8x32xf32, #tpu.memory_space<vmem>>, %arg15: memref<16x32xbf16, #tpu.memory_space<vmem>>) attributes {dimension_semantics = [#tpu.dimension_semantics<parallel>], iteration_bounds = array<i64: 1>, scalar_prefetch = 0 : i64, scratch_operands = 1 : i64, tpu.core_type = #tpu.core_type<tc>, window_params = [{transform_indices = @transform_0, window_bounds = array<i64: 2, 8, 32>}, {pipeline_mode = #tpu.pipeline_mode<synchronous>, transform_indices = @transform_1, window_bounds = array<i64: 1, 32>}, {pipeline_mode = #tpu.pipeline_mode<synchronous>, transform_indices = @transform_2, window_bounds = array<i64: 1, 32>}, {pipeline_mode = #tpu.pipeline_mode<synchronous>, transform_indices = @transform_3, window_bounds = array<i64: 32, 96>}, {pipeline_mode = #tpu.pipeline_mode<synchronous>, transform_indices = @transform_4, window_bounds = array<i64: 1, 96>}, {pipeline_mode = #tpu.pipeline_mode<synchronous>, transform_indices = @transform_5, window_bounds = array<i64: 32, 32>}, {pipeline_mode = #tpu.pipeline_mode<synchronous>, transform_indices = @transform_6, window_bounds = array<i64: 1, 32>}, {pipeline_mode = #tpu.pipeline_mode<synchronous>, transform_indices = @transform_7, window_bounds = array<i64: 1, 32>}, {pipeline_mode = #tpu.pipeline_mode<synchronous>, transform_indices = @transform_8, window_bounds = array<i64: 1, 32>}, {pipeline_mode = #tpu.pipeline_mode<synchronous>, transform_indices = @transform_9, window_bounds = array<i64: 32, 128>}, {pipeline_mode = #tpu.pipeline_mode<synchronous>, transform_indices = @transform_10, window_bounds = array<i64: 1, 128>}, {pipeline_mode = #tpu.pipeline_mode<synchronous>, transform_indices = @transform_11, window_bounds = array<i64: 128, 32>}, {pipeline_mode = #tpu.pipeline_mode<synchronous>, transform_indices = @transform_12, window_bounds = array<i64: 1, 32>}, {transform_indices = @transform_13, window_bounds = array<i64: 2, 8, 32>}]} {
    %c0 = arith.constant 0 : index
    %c0_0 = arith.constant 0 : index
    %c0_1 = arith.constant 0 : index
    %0 = vector.load %arg1[%c0, %c0_0, %c0_1] : memref<2x8x32xf32, #tpu.memory_space<vmem>>, vector<2x8x32xf32>
    %1 = vector.shape_cast %0 : vector<2x8x32xf32> to vector<16x32xf32>
    %c0_2 = arith.constant 0 : index
    %c0_3 = arith.constant 0 : index
    %2 = vector.load %arg2[%c0_2, %c0_3] : memref<1x32xf32, #tpu.memory_space<vmem>>, vector<1x32xf32>
    %3 = vector.shape_cast %2 : vector<1x32xf32> to vector<32xf32>
    %c0_4 = arith.constant 0 : index
    %c0_5 = arith.constant 0 : index
    %4 = vector.load %arg3[%c0_4, %c0_5] : memref<1x32xf32, #tpu.memory_space<vmem>>, vector<1x32xf32>
    %5 = vector.shape_cast %4 : vector<1x32xf32> to vector<32xf32>
    %cst = arith.constant dense<0.000000e+00> : vector<16xf32>
    %6 = vector.multi_reduction <add>, %1, %cst [1] : vector<16x32xf32> to vector<16xf32>
    %7 = vector.shape_cast %6 : vector<16xf32> to vector<16x1xf32>
    %cst_6 = arith.constant 3.200000e+01 : f32
    %8 = vector.broadcast %cst_6 : f32 to vector<16x1xf32>
    %9 = arith.divf %7, %8 : vector<16x1xf32>
    %10 = vector.broadcast %9 : vector<16x1xf32> to vector<16x32xf32>
    %11 = arith.subf %1, %10 : vector<16x32xf32>
    %12 = arith.mulf %11, %11 : vector<16x32xf32>
    %cst_7 = arith.constant dense<0.000000e+00> : vector<16xf32>
    %13 = vector.multi_reduction <add>, %12, %cst_7 [1] : vector<16x32xf32> to vector<16xf32>
    %14 = vector.shape_cast %13 : vector<16xf32> to vector<16x1xf32>
    %cst_8 = arith.constant 3.200000e+01 : f32
    %15 = vector.broadcast %cst_8 : f32 to vector<16x1xf32>
    %16 = arith.divf %14, %15 : vector<16x1xf32>
    %17 = vector.broadcast %9 : vector<16x1xf32> to vector<16x32xf32>
    %18 = arith.subf %1, %17 : vector<16x32xf32>
    %cst_9 = arith.constant 9.99999974E-6 : f32
    %19 = vector.broadcast %cst_9 : f32 to vector<16x1xf32>
    %20 = arith.addf %16, %19 : vector<16x1xf32>
    %21 = math.rsqrt %20 : vector<16x1xf32>
    %22 = vector.broadcast %21 : vector<16x1xf32> to vector<16x32xf32>
    %23 = arith.mulf %18, %22 : vector<16x32xf32>
    %24 = vector.shape_cast %3 : vector<32xf32> to vector<1x32xf32>
    %25 = vector.broadcast %24 : vector<1x32xf32> to vector<16x32xf32>
    %26 = arith.mulf %23, %25 : vector<16x32xf32>
    %27 = vector.shape_cast %5 : vector<32xf32> to vector<1x32xf32>
    %28 = vector.broadcast %27 : vector<1x32xf32> to vector<16x32xf32>
    %29 = arith.addf %26, %28 : vector<16x32xf32>
    %30 = arith.truncf %29 : vector<16x32xf32> to vector<16x32xbf16>
    %c0_10 = arith.constant 0 : index
    %c0_11 = arith.constant 0 : index
    %31 = vector.load %arg4[%c0_10, %c0_11] : memref<32x96xbf16, #tpu.memory_space<vmem>>, vector<32x96xbf16>
    %cst_12 = arith.constant dense<0.000000e+00> : vector<16x96xf32>
    %32 = tpu.matmul %30, %31, %cst_12 {dimension_numbers = #tpu.dot_dimension_numbers<[1], [0], [0], [1], [0, 0, 1, 1], [], []>} : vector<16x32xbf16>, vector<32x96xbf16>, vector<16x96xf32> -> vector<16x96xf32>
    %c0_13 = arith.constant 0 : index
    %c0_14 = arith.constant 0 : index
    %33 = vector.load %arg5[%c0_13, %c0_14] : memref<1x96xf32, #tpu.memory_space<vmem>>, vector<1x96xf32>
    %34 = vector.shape_cast %33 : vector<1x96xf32> to vector<96xf32>
    %35 = vector.shape_cast %34 : vector<96xf32> to vector<1x96xf32>
    %36 = vector.broadcast %35 : vector<1x96xf32> to vector<16x96xf32>
    %37 = arith.addf %32, %36 : vector<16x96xf32>
    %38 = vector.extract_strided_slice %37 {offsets = [0, 0], sizes = [16, 32], strides = [1, 1]} : vector<16x96xf32> to vector<16x32xf32>
    %39 = arith.truncf %38 : vector<16x32xf32> to vector<16x32xbf16>
    %40 = vector.extract_strided_slice %37 {offsets = [0, 32], sizes = [16, 32], strides = [1, 1]} : vector<16x96xf32> to vector<16x32xf32>
    %41 = arith.truncf %40 : vector<16x32xf32> to vector<16x32xbf16>
    %42 = vector.extract_strided_slice %37 {offsets = [0, 64], sizes = [16, 32], strides = [1, 1]} : vector<16x96xf32> to vector<16x32xf32>
    %43 = arith.truncf %42 : vector<16x32xf32> to vector<16x32xbf16>
    %44 = vector.extract_strided_slice %39 {offsets = [0, 0], sizes = [16, 8], strides = [1, 1]} : vector<16x32xbf16> to vector<16x8xbf16>
    %45 = vector.shape_cast %44 : vector<16x8xbf16> to vector<2x8x8xbf16>
    %46 = vector.extract_strided_slice %41 {offsets = [0, 0], sizes = [16, 8], strides = [1, 1]} : vector<16x32xbf16> to vector<16x8xbf16>
    %47 = vector.shape_cast %46 : vector<16x8xbf16> to vector<2x8x8xbf16>
    %48 = vector.extract_strided_slice %43 {offsets = [0, 0], sizes = [16, 8], strides = [1, 1]} : vector<16x32xbf16> to vector<16x8xbf16>
    %49 = vector.shape_cast %48 : vector<16x8xbf16> to vector<2x8x8xbf16>
    "tpu.trace_start"() <{level = 10 : i32, message = "bqd,bkd->bqk"}> : () -> ()
    %cst_15 = arith.constant dense<0.000000e+00> : vector<2x8x8xf32>
    %50 = tpu.matmul %45, %47, %cst_15 {dimension_numbers = #tpu.dot_dimension_numbers<[2], [2], [1], [1], [0, 0, 0, 1, 1, 1], [0], [0]>} : vector<2x8x8xbf16>, vector<2x8x8xbf16>, vector<2x8x8xf32> -> vector<2x8x8xf32>
    "tpu.trace_stop"() : () -> ()
    %cst_16 = arith.constant dense<0xFF800000> : vector<2x8xf32>
    %51 = vector.multi_reduction <maximumf>, %50, %cst_16 [2] : vector<2x8x8xf32> to vector<2x8xf32>
    %52 = vector.shape_cast %51 : vector<2x8xf32> to vector<2x8x1xf32>
    %53 = vector.broadcast %52 : vector<2x8x1xf32> to vector<2x8x8xf32>
    %54 = arith.subf %50, %53 : vector<2x8x8xf32>
    %55 = math.exp %54 : vector<2x8x8xf32>
    %cst_17 = arith.constant dense<0.000000e+00> : vector<2x8xf32>
    %56 = vector.multi_reduction <add>, %55, %cst_17 [2] : vector<2x8x8xf32> to vector<2x8xf32>
    %57 = vector.shape_cast %56 : vector<2x8xf32> to vector<2x8x1xf32>
    %58 = tpu.reciprocal %57 {approx = true} : vector<2x8x1xf32> -> vector<2x8x1xf32>
    %59 = vector.broadcast %58 : vector<2x8x1xf32> to vector<2x8x8xf32>
    %60 = arith.mulf %55, %59 : vector<2x8x8xf32>
    %61 = arith.truncf %60 : vector<2x8x8xf32> to vector<2x8x8xbf16>
    "tpu.trace_start"() <{level = 10 : i32, message = "bqk,bkd->bqd"}> : () -> ()
    %cst_18 = arith.constant dense<0.000000e+00> : vector<2x8x8xf32>
    %62 = tpu.matmul %61, %49, %cst_18 {dimension_numbers = #tpu.dot_dimension_numbers<[2], [1], [1], [2], [0, 0, 0, 1, 1, 2], [0], [0]>} : vector<2x8x8xbf16>, vector<2x8x8xbf16>, vector<2x8x8xf32> -> vector<2x8x8xf32>
    "tpu.trace_stop"() : () -> ()
    %63 = vector.shape_cast %62 : vector<2x8x8xf32> to vector<16x8xf32>
    %64 = arith.truncf %63 : vector<16x8xf32> to vector<16x8xbf16>
    %c0_19 = arith.constant 0 : index
    %c0_20 = arith.constant 0 : index
    %65 = vector.load %arg15[%c0_19, %c0_20] : memref<16x32xbf16, #tpu.memory_space<vmem>>, vector<16x8xbf16>
    tpu.vector_store %arg15[%c0_19, %c0_20], %64 {strides = array<i32>} : memref<16x32xbf16, #tpu.memory_space<vmem>>, vector<16x8xbf16>,
    %66 = vector.extract_strided_slice %39 {offsets = [0, 8], sizes = [16, 8], strides = [1, 1]} : vector<16x32xbf16> to vector<16x8xbf16>
    %67 = vector.shape_cast %66 : vector<16x8xbf16> to vector<2x8x8xbf16>
    %68 = vector.extract_strided_slice %41 {offsets = [0, 8], sizes = [16, 8], strides = [1, 1]} : vector<16x32xbf16> to vector<16x8xbf16>
    %69 = vector.shape_cast %68 : vector<16x8xbf16> to vector<2x8x8xbf16>
    %70 = vector.extract_strided_slice %43 {offsets = [0, 8], sizes = [16, 8], strides = [1, 1]} : vector<16x32xbf16> to vector<16x8xbf16>
    %71 = vector.shape_cast %70 : vector<16x8xbf16> to vector<2x8x8xbf16>
    "tpu.trace_start"() <{level = 10 : i32, message = "bqd,bkd->bqk"}> : () -> ()
    %cst_21 = arith.constant dense<0.000000e+00> : vector<2x8x8xf32>
    %72 = tpu.matmul %67, %69, %cst_21 {dimension_numbers = #tpu.dot_dimension_numbers<[2], [2], [1], [1], [0, 0, 0, 1, 1, 1], [0], [0]>} : vector<2x8x8xbf16>, vector<2x8x8xbf16>, vector<2x8x8xf32> -> vector<2x8x8xf32>
    "tpu.trace_stop"() : () -> ()
    %cst_22 = arith.constant dense<0xFF800000> : vector<2x8xf32>
    %73 = vector.multi_reduction <maximumf>, %72, %cst_22 [2] : vector<2x8x8xf32> to vector<2x8xf32>
    %74 = vector.shape_cast %73 : vector<2x8xf32> to vector<2x8x1xf32>
    %75 = vector.broadcast %74 : vector<2x8x1xf32> to vector<2x8x8xf32>
    %76 = arith.subf %72, %75 : vector<2x8x8xf32>
    %77 = math.exp %76 : vector<2x8x8xf32>
    %cst_23 = arith.constant dense<0.000000e+00> : vector<2x8xf32>
    %78 = vector.multi_reduction <add>, %77, %cst_23 [2] : vector<2x8x8xf32> to vector<2x8xf32>
    %79 = vector.shape_cast %78 : vector<2x8xf32> to vector<2x8x1xf32>
    %80 = tpu.reciprocal %79 {approx = true} : vector<2x8x1xf32> -> vector<2x8x1xf32>
    %81 = vector.broadcast %80 : vector<2x8x1xf32> to vector<2x8x8xf32>
    %82 = arith.mulf %77, %81 : vector<2x8x8xf32>
    %83 = arith.truncf %82 : vector<2x8x8xf32> to vector<2x8x8xbf16>
    "tpu.trace_start"() <{level = 10 : i32, message = "bqk,bkd->bqd"}> : () -> ()
    %cst_24 = arith.constant dense<0.000000e+00> : vector<2x8x8xf32>
    %84 = tpu.matmul %83, %71, %cst_24 {dimension_numbers = #tpu.dot_dimension_numbers<[2], [1], [1], [2], [0, 0, 0, 1, 1, 2], [0], [0]>} : vector<2x8x8xbf16>, vector<2x8x8xbf16>, vector<2x8x8xf32> -> vector<2x8x8xf32>
    "tpu.trace_stop"() : () -> ()
    %85 = vector.shape_cast %84 : vector<2x8x8xf32> to vector<16x8xf32>
    %86 = arith.truncf %85 : vector<16x8xf32> to vector<16x8xbf16>
    %c0_25 = arith.constant 0 : index
    %c8 = arith.constant 8 : index
    %87 = vector.load %arg15[%c0_25, %c8] : memref<16x32xbf16, #tpu.memory_space<vmem>>, vector<16x8xbf16>
    tpu.vector_store %arg15[%c0_25, %c8], %86 {strides = array<i32>} : memref<16x32xbf16, #tpu.memory_space<vmem>>, vector<16x8xbf16>,
    %88 = vector.extract_strided_slice %39 {offsets = [0, 16], sizes = [16, 8], strides = [1, 1]} : vector<16x32xbf16> to vector<16x8xbf16>
    %89 = vector.shape_cast %88 : vector<16x8xbf16> to vector<2x8x8xbf16>
    %90 = vector.extract_strided_slice %41 {offsets = [0, 16], sizes = [16, 8], strides = [1, 1]} : vector<16x32xbf16> to vector<16x8xbf16>
    %91 = vector.shape_cast %90 : vector<16x8xbf16> to vector<2x8x8xbf16>
    %92 = vector.extract_strided_slice %43 {offsets = [0, 16], sizes = [16, 8], strides = [1, 1]} : vector<16x32xbf16> to vector<16x8xbf16>
    %93 = vector.shape_cast %92 : vector<16x8xbf16> to vector<2x8x8xbf16>
    "tpu.trace_start"() <{level = 10 : i32, message = "bqd,bkd->bqk"}> : () -> ()
    %cst_26 = arith.constant dense<0.000000e+00> : vector<2x8x8xf32>
    %94 = tpu.matmul %89, %91, %cst_26 {dimension_numbers = #tpu.dot_dimension_numbers<[2], [2], [1], [1], [0, 0, 0, 1, 1, 1], [0], [0]>} : vector<2x8x8xbf16>, vector<2x8x8xbf16>, vector<2x8x8xf32> -> vector<2x8x8xf32>
    "tpu.trace_stop"() : () -> ()
    %cst_27 = arith.constant dense<0xFF800000> : vector<2x8xf32>
    %95 = vector.multi_reduction <maximumf>, %94, %cst_27 [2] : vector<2x8x8xf32> to vector<2x8xf32>
    %96 = vector.shape_cast %95 : vector<2x8xf32> to vector<2x8x1xf32>
    %97 = vector.broadcast %96 : vector<2x8x1xf32> to vector<2x8x8xf32>
    %98 = arith.subf %94, %97 : vector<2x8x8xf32>
    %99 = math.exp %98 : vector<2x8x8xf32>
    %cst_28 = arith.constant dense<0.000000e+00> : vector<2x8xf32>
    %100 = vector.multi_reduction <add>, %99, %cst_28 [2] : vector<2x8x8xf32> to vector<2x8xf32>
    %101 = vector.shape_cast %100 : vector<2x8xf32> to vector<2x8x1xf32>
    %102 = tpu.reciprocal %101 {approx = true} : vector<2x8x1xf32> -> vector<2x8x1xf32>
    %103 = vector.broadcast %102 : vector<2x8x1xf32> to vector<2x8x8xf32>
    %104 = arith.mulf %99, %103 : vector<2x8x8xf32>
    %105 = arith.truncf %104 : vector<2x8x8xf32> to vector<2x8x8xbf16>
    "tpu.trace_start"() <{level = 10 : i32, message = "bqk,bkd->bqd"}> : () -> ()
    %cst_29 = arith.constant dense<0.000000e+00> : vector<2x8x8xf32>
    %106 = tpu.matmul %105, %93, %cst_29 {dimension_numbers = #tpu.dot_dimension_numbers<[2], [1], [1], [2], [0, 0, 0, 1, 1, 2], [0], [0]>} : vector<2x8x8xbf16>, vector<2x8x8xbf16>, vector<2x8x8xf32> -> vector<2x8x8xf32>
    "tpu.trace_stop"() : () -> ()
    %107 = vector.shape_cast %106 : vector<2x8x8xf32> to vector<16x8xf32>
    %108 = arith.truncf %107 : vector<16x8xf32> to vector<16x8xbf16>
    %c0_30 = arith.constant 0 : index
    %c16 = arith.constant 16 : index
    %109 = vector.load %arg15[%c0_30, %c16] : memref<16x32xbf16, #tpu.memory_space<vmem>>, vector<16x8xbf16>
    tpu.vector_store %arg15[%c0_30, %c16], %108 {strides = array<i32>} : memref<16x32xbf16, #tpu.memory_space<vmem>>, vector<16x8xbf16>,
    %110 = vector.extract_strided_slice %39 {offsets = [0, 24], sizes = [16, 8], strides = [1, 1]} : vector<16x32xbf16> to vector<16x8xbf16>
    %111 = vector.shape_cast %110 : vector<16x8xbf16> to vector<2x8x8xbf16>
    %112 = vector.extract_strided_slice %41 {offsets = [0, 24], sizes = [16, 8], strides = [1, 1]} : vector<16x32xbf16> to vector<16x8xbf16>
    %113 = vector.shape_cast %112 : vector<16x8xbf16> to vector<2x8x8xbf16>
    %114 = vector.extract_strided_slice %43 {offsets = [0, 24], sizes = [16, 8], strides = [1, 1]} : vector<16x32xbf16> to vector<16x8xbf16>
    %115 = vector.shape_cast %114 : vector<16x8xbf16> to vector<2x8x8xbf16>
    "tpu.trace_start"() <{level = 10 : i32, message = "bqd,bkd->bqk"}> : () -> ()
    %cst_31 = arith.constant dense<0.000000e+00> : vector<2x8x8xf32>
    %116 = tpu.matmul %111, %113, %cst_31 {dimension_numbers = #tpu.dot_dimension_numbers<[2], [2], [1], [1], [0, 0, 0, 1, 1, 1], [0], [0]>} : vector<2x8x8xbf16>, vector<2x8x8xbf16>, vector<2x8x8xf32> -> vector<2x8x8xf32>
    "tpu.trace_stop"() : () -> ()
    %cst_32 = arith.constant dense<0xFF800000> : vector<2x8xf32>
    %117 = vector.multi_reduction <maximumf>, %116, %cst_32 [2] : vector<2x8x8xf32> to vector<2x8xf32>
    %118 = vector.shape_cast %117 : vector<2x8xf32> to vector<2x8x1xf32>
    %119 = vector.broadcast %118 : vector<2x8x1xf32> to vector<2x8x8xf32>
    %120 = arith.subf %116, %119 : vector<2x8x8xf32>
    %121 = math.exp %120 : vector<2x8x8xf32>
    %cst_33 = arith.constant dense<0.000000e+00> : vector<2x8xf32>
    %122 = vector.multi_reduction <add>, %121, %cst_33 [2] : vector<2x8x8xf32> to vector<2x8xf32>
    %123 = vector.shape_cast %122 : vector<2x8xf32> to vector<2x8x1xf32>
    %124 = tpu.reciprocal %123 {approx = true} : vector<2x8x1xf32> -> vector<2x8x1xf32>
    %125 = vector.broadcast %124 : vector<2x8x1xf32> to vector<2x8x8xf32>
    %126 = arith.mulf %121, %125 : vector<2x8x8xf32>
    %127 = arith.truncf %126 : vector<2x8x8xf32> to vector<2x8x8xbf16>
    "tpu.trace_start"() <{level = 10 : i32, message = "bqk,bkd->bqd"}> : () -> ()
    %cst_34 = arith.constant dense<0.000000e+00> : vector<2x8x8xf32>
    %128 = tpu.matmul %127, %115, %cst_34 {dimension_numbers = #tpu.dot_dimension_numbers<[2], [1], [1], [2], [0, 0, 0, 1, 1, 2], [0], [0]>} : vector<2x8x8xbf16>, vector<2x8x8xbf16>, vector<2x8x8xf32> -> vector<2x8x8xf32>
    "tpu.trace_stop"() : () -> ()
    %129 = vector.shape_cast %128 : vector<2x8x8xf32> to vector<16x8xf32>
    %130 = arith.truncf %129 : vector<16x8xf32> to vector<16x8xbf16>
    %c0_35 = arith.constant 0 : index
    %c24 = arith.constant 24 : index
    %131 = vector.load %arg15[%c0_35, %c24] : memref<16x32xbf16, #tpu.memory_space<vmem>>, vector<16x8xbf16>
    tpu.vector_store %arg15[%c0_35, %c24], %130 {strides = array<i32>} : memref<16x32xbf16, #tpu.memory_space<vmem>>, vector<16x8xbf16>,
    %c0_36 = arith.constant 0 : index
    %c0_37 = arith.constant 0 : index
    %132 = vector.load %arg15[%c0_36, %c0_37] : memref<16x32xbf16, #tpu.memory_space<vmem>>, vector<16x32xbf16>
    %c0_38 = arith.constant 0 : index
    %c0_39 = arith.constant 0 : index
    %133 = vector.load %arg6[%c0_38, %c0_39] : memref<32x32xbf16, #tpu.memory_space<vmem>>, vector<32x32xbf16>
    %cst_40 = arith.constant dense<0.000000e+00> : vector<16x32xf32>
    %134 = tpu.matmul %132, %133, %cst_40 {dimension_numbers = #tpu.dot_dimension_numbers<[1], [0], [0], [1], [0, 0, 1, 1], [], []>} : vector<16x32xbf16>, vector<32x32xbf16>, vector<16x32xf32> -> vector<16x32xf32>
    %c0_41 = arith.constant 0 : index
    %c0_42 = arith.constant 0 : index
    %135 = vector.load %arg7[%c0_41, %c0_42] : memref<1x32xf32, #tpu.memory_space<vmem>>, vector<1x32xf32>
    %136 = vector.shape_cast %135 : vector<1x32xf32> to vector<32xf32>
    %137 = vector.shape_cast %136 : vector<32xf32> to vector<1x32xf32>
    %138 = vector.broadcast %137 : vector<1x32xf32> to vector<16x32xf32>
    %139 = arith.addf %134, %138 : vector<16x32xf32>
    %140 = arith.addf %1, %139 : vector<16x32xf32>
    %c0_43 = arith.constant 0 : index
    %c0_44 = arith.constant 0 : index
    %141 = vector.load %arg8[%c0_43, %c0_44] : memref<1x32xf32, #tpu.memory_space<vmem>>, vector<1x32xf32>
    %142 = vector.shape_cast %141 : vector<1x32xf32> to vector<32xf32>
    %c0_45 = arith.constant 0 : index
    %c0_46 = arith.constant 0 : index
    %143 = vector.load %arg9[%c0_45, %c0_46] : memref<1x32xf32, #tpu.memory_space<vmem>>, vector<1x32xf32>
    %144 = vector.shape_cast %143 : vector<1x32xf32> to vector<32xf32>
    %cst_47 = arith.constant dense<0.000000e+00> : vector<16xf32>
    %145 = vector.multi_reduction <add>, %140, %cst_47 [1] : vector<16x32xf32> to vector<16xf32>
    %146 = vector.shape_cast %145 : vector<16xf32> to vector<16x1xf32>
    %cst_48 = arith.constant 3.200000e+01 : f32
    %147 = vector.broadcast %cst_48 : f32 to vector<16x1xf32>
    %148 = arith.divf %146, %147 : vector<16x1xf32>
    %149 = vector.broadcast %148 : vector<16x1xf32> to vector<16x32xf32>
    %150 = arith.subf %140, %149 : vector<16x32xf32>
    %151 = arith.mulf %150, %150 : vector<16x32xf32>
    %cst_49 = arith.constant dense<0.000000e+00> : vector<16xf32>
    %152 = vector.multi_reduction <add>, %151, %cst_49 [1] : vector<16x32xf32> to vector<16xf32>
    %153 = vector.shape_cast %152 : vector<16xf32> to vector<16x1xf32>
    %cst_50 = arith.constant 3.200000e+01 : f32
    %154 = vector.broadcast %cst_50 : f32 to vector<16x1xf32>
    %155 = arith.divf %153, %154 : vector<16x1xf32>
    %156 = vector.broadcast %148 : vector<16x1xf32> to vector<16x32xf32>
    %157 = arith.subf %140, %156 : vector<16x32xf32>
    %cst_51 = arith.constant 9.99999974E-6 : f32
    %158 = vector.broadcast %cst_51 : f32 to vector<16x1xf32>
    %159 = arith.addf %155, %158 : vector<16x1xf32>
    %160 = math.rsqrt %159 : vector<16x1xf32>
    %161 = vector.broadcast %160 : vector<16x1xf32> to vector<16x32xf32>
    %162 = arith.mulf %157, %161 : vector<16x32xf32>
    %163 = vector.shape_cast %142 : vector<32xf32> to vector<1x32xf32>
    %164 = vector.broadcast %163 : vector<1x32xf32> to vector<16x32xf32>
    %165 = arith.mulf %162, %164 : vector<16x32xf32>
    %166 = vector.shape_cast %144 : vector<32xf32> to vector<1x32xf32>
    %167 = vector.broadcast %166 : vector<1x32xf32> to vector<16x32xf32>
    %168 = arith.addf %165, %167 : vector<16x32xf32>
    %169 = arith.truncf %168 : vector<16x32xf32> to vector<16x32xbf16>
    %c0_52 = arith.constant 0 : index
    %c0_53 = arith.constant 0 : index
    %170 = vector.load %arg10[%c0_52, %c0_53] : memref<32x128xbf16, #tpu.memory_space<vmem>>, vector<32x128xbf16>
    %cst_54 = arith.constant dense<0.000000e+00> : vector<16x128xf32>
    %171 = tpu.matmul %169, %170, %cst_54 {dimension_numbers = #tpu.dot_dimension_numbers<[1], [0], [0], [1], [0, 0, 1, 1], [], []>} : vector<16x32xbf16>, vector<32x128xbf16>, vector<16x128xf32> -> vector<16x128xf32>
    %c0_55 = arith.constant 0 : index
    %c0_56 = arith.constant 0 : index
    %172 = vector.load %arg11[%c0_55, %c0_56] : memref<1x128xf32, #tpu.memory_space<vmem>>, vector<1x128xf32>
    %173 = vector.shape_cast %172 : vector<1x128xf32> to vector<128xf32>
    %174 = vector.shape_cast %173 : vector<128xf32> to vector<1x128xf32>
    %175 = vector.broadcast %174 : vector<1x128xf32> to vector<16x128xf32>
    %176 = arith.addf %171, %175 : vector<16x128xf32>
    %cst_57 = arith.constant 5.000000e-01 : f32
    %177 = vector.broadcast %cst_57 : f32 to vector<16x128xf32>
    %178 = arith.mulf %177, %176 : vector<16x128xf32>
    %cst_58 = arith.constant 0.707106769 : f32
    %179 = vector.broadcast %cst_58 : f32 to vector<16x128xf32>
    %180 = arith.mulf %176, %179 : vector<16x128xf32>
    %181 = math.erf %180 : vector<16x128xf32>
    %cst_59 = arith.constant 1.000000e+00 : f32
    %182 = vector.broadcast %cst_59 : f32 to vector<16x128xf32>
    %183 = arith.addf %182, %181 : vector<16x128xf32>
    %184 = arith.mulf %178, %183 : vector<16x128xf32>
    %185 = arith.truncf %184 : vector<16x128xf32> to vector<16x128xbf16>
    %c0_60 = arith.constant 0 : index
    %c0_61 = arith.constant 0 : index
    %186 = vector.load %arg12[%c0_60, %c0_61] : memref<128x32xbf16, #tpu.memory_space<vmem>>, vector<128x32xbf16>
    %cst_62 = arith.constant dense<0.000000e+00> : vector<16x32xf32>
    %187 = tpu.matmul %185, %186, %cst_62 {dimension_numbers = #tpu.dot_dimension_numbers<[1], [0], [0], [1], [0, 0, 1, 1], [], []>} : vector<16x128xbf16>, vector<128x32xbf16>, vector<16x32xf32> -> vector<16x32xf32>
    %c0_63 = arith.constant 0 : index
    %c0_64 = arith.constant 0 : index
    %188 = vector.load %arg13[%c0_63, %c0_64] : memref<1x32xf32, #tpu.memory_space<vmem>>, vector<1x32xf32>
    %189 = vector.shape_cast %188 : vector<1x32xf32> to vector<32xf32>
    %190 = vector.shape_cast %189 : vector<32xf32> to vector<1x32xf32>
    %191 = vector.broadcast %190 : vector<1x32xf32> to vector<16x32xf32>
    %192 = arith.addf %187, %191 : vector<16x32xf32>
    %193 = arith.addf %140, %192 : vector<16x32xf32>
    %194 = vector.shape_cast %193 : vector<16x32xf32> to vector<2x8x32xf32>
    %c0_65 = arith.constant 0 : index
    %c0_66 = arith.constant 0 : index
    %c0_67 = arith.constant 0 : index
    %195 = vector.load %arg14[%c0_65, %c0_66, %c0_67] : memref<2x8x32xf32, #tpu.memory_space<vmem>>, vector<2x8x32xf32>
    tpu.vector_store %arg14[%c0_65, %c0_66, %c0_67], %194 {strides = array<i32>} : memref<2x8x32xf32, #tpu.memory_space<vmem>>, vector<2x8x32xf32>,
    return
  }
  func.func @transform_0(%arg0: i32) -> (i32, i32, i32) {
    %c0_i32 = arith.constant 0 : i32
    %c0_i32_0 = arith.constant 0 : i32
    %c0_i32_1 = arith.constant 0 : i32
    return %arg0, %c0_i32, %c0_i32_0 : i32, i32, i32
  }
  func.func @transform_1(%arg0: i32) -> (i32, i32) {
    %c0_i32 = arith.constant 0 : i32
    %c0_i32_0 = arith.constant 0 : i32
    %c0_i32_1 = arith.constant 0 : i32
    return %c0_i32, %c0_i32_0 : i32, i32
  }
  func.func @transform_2(%arg0: i32) -> (i32, i32) {
    %c0_i32 = arith.constant 0 : i32
    %c0_i32_0 = arith.constant 0 : i32
    %c0_i32_1 = arith.constant 0 : i32
    return %c0_i32, %c0_i32_0 : i32, i32
  }
  func.func @transform_3(%arg0: i32) -> (i32, i32) {
    %c0_i32 = arith.constant 0 : i32
    %c0_i32_0 = arith.constant 0 : i32
    %c0_i32_1 = arith.constant 0 : i32
    return %c0_i32, %c0_i32_0 : i32, i32
  }
  func.func @transform_4(%arg0: i32) -> (i32, i32) {
    %c0_i32 = arith.constant 0 : i32
    %c0_i32_0 = arith.constant 0 : i32
    %c0_i32_1 = arith.constant 0 : i32
    return %c0_i32, %c0_i32_0 : i32, i32
  }
  func.func @transform_5(%arg0: i32) -> (i32, i32) {
    %c0_i32 = arith.constant 0 : i32
    %c0_i32_0 = arith.constant 0 : i32
    %c0_i32_1 = arith.constant 0 : i32
    return %c0_i32, %c0_i32_0 : i32, i32
  }
  func.func @transform_6(%arg0: i32) -> (i32, i32) {
    %c0_i32 = arith.constant 0 : i32
    %c0_i32_0 = arith.constant 0 : i32
    %c0_i32_1 = arith.constant 0 : i32
    return %c0_i32, %c0_i32_0 : i32, i32
  }
  func.func @transform_7(%arg0: i32) -> (i32, i32) {
    %c0_i32 = arith.constant 0 : i32
    %c0_i32_0 = arith.constant 0 : i32
    %c0_i32_1 = arith.constant 0 : i32
    return %c0_i32, %c0_i32_0 : i32, i32
  }
  func.func @transform_8(%arg0: i32) -> (i32, i32) {
    %c0_i32 = arith.constant 0 : i32
    %c0_i32_0 = arith.constant 0 : i32
    %c0_i32_1 = arith.constant 0 : i32
    return %c0_i32, %c0_i32_0 : i32, i32
  }
  func.func @transform_9(%arg0: i32) -> (i32, i32) {
    %c0_i32 = arith.constant 0 : i32
    %c0_i32_0 = arith.constant 0 : i32
    %c0_i32_1 = arith.constant 0 : i32
    return %c0_i32, %c0_i32_0 : i32, i32
  }
  func.func @transform_10(%arg0: i32) -> (i32, i32) {
    %c0_i32 = arith.constant 0 : i32
    %c0_i32_0 = arith.constant 0 : i32
    %c0_i32_1 = arith.constant 0 : i32
    return %c0_i32, %c0_i32_0 : i32, i32
  }
  func.func @transform_11(%arg0: i32) -> (i32, i32) {
    %c0_i32 = arith.constant 0 : i32
    %c0_i32_0 = arith.constant 0 : i32
    %c0_i32_1 = arith.constant 0 : i32
    return %c0_i32, %c0_i32_0 : i32, i32
  }
  func.func @transform_12(%arg0: i32) -> (i32, i32) {
    %c0_i32 = arith.constant 0 : i32
    %c0_i32_0 = arith.constant 0 : i32
    %c0_i32_1 = arith.constant 0 : i32
    return %c0_i32, %c0_i32_0 : i32, i32
  }
  func.func @transform_13(%arg0: i32) -> (i32, i32, i32) {
    %c0_i32 = arith.constant 0 : i32
    %c0_i32_0 = arith.constant 0 : i32
    %c0_i32_1 = arith.constant 0 : i32
    return %arg0, %c0_i32, %c0_i32_0 : i32, i32, i32
  }
}

</mosaic_0001>

<bundles_post_ra>
// kernel: tpu_custom_call.1
= control target key start
LH: loop header
LB: loop body
LE: loop exit
PB: predicated region body
PF: predicated region fallthrough
CT: control target
= control target key end

     0   :  { %18 = vsyncpa [#allocation4], 0  ;;  %s2704_s0 = inlined_call_operand.hbm [shape: f32[2,8,32], index: 0, kind: input, shape index: {}]   ;;  %s2705_s1 = inlined_call_operand.hbm [shape: f32[1,32], index: 1, kind: input, shape index: {}]   ;;  %s2706_s2 = inlined_call_operand.hbm [shape: f32[1,32], index: 2, kind: input, shape index: {}]   ;;  %s2707_s3 = inlined_call_operand.hbm [shape: bf16[32,96], index: 3, kind: input, shape index: {}]   ;;  %s2708_s4 = inlined_call_operand.hbm [shape: f32[1,96], index: 4, kind: input, shape index: {}]   ;;  %s2709_s5 = inlined_call_operand.hbm [shape: bf16[32,32], index: 5, kind: input, shape index: {}]   ;;  %s2710_s6 = inlined_call_operand.hbm [shape: f32[1,32], index: 6, kind: input, shape index: {}]   ;;  %s2711_s7 = inlined_call_operand.hbm [shape: f32[1,32], index: 7, kind: input, shape index: {}]   ;;  %s2712_s8 = inlined_call_operand.hbm [shape: f32[1,32], index: 8, kind: input, shape index: {}]   ;;  %s2713_s9 = inlined_call_operand.hbm [shape: bf16[32,128], index: 9, kind: input, shape index: {}]   ;;  %s2714_s10 = inlined_call_operand.hbm [shape: f32[1,128], index: 10, kind: input, shape index: {}]   ;;  %s2715_s11 = inlined_call_operand.hbm [shape: bf16[128,32], index: 11, kind: input, shape index: {}]   ;;  %s2716_s12 = inlined_call_operand.hbm [shape: f32[1,32], index: 12, kind: input, shape index: {}]   ;;  %s2717_s13 = inlined_call_operand.hbm [shape: f32[2,8,32], index: 13, kind: output, shape index: {}]  }
   0x1   :  { %19 = vsyncpa [#allocation7], 0 }
   0x2   :  { %20 = vsyncpa [#allocation10], 0 }
   0x3   :  { %21 = vsyncpa [#allocation13], 0 }
   0x4   :  { %22 = vsyncpa [#allocation16], 0 }
   0x5   :  { %23 = vsyncpa [#allocation19], 0 }
   0x6   :  { %24 = vsyncpa [#allocation22], 0 }
   0x7   :  { %25 = vsyncpa [#allocation5], 0  ;;  %s2210_s25 = smov [#allocation6]   ;;  %s2211_s27 = smov [#allocation9]  }
   0x8   :  { %s44_s26 = sshll.u32 %s2210_s25, 4  ;;  %s63_s28 = sshll.u32 %s2211_s27, 4  ;;  %s45_s26 = int_to_ptr.vmem [resolvable:$true] %s44_s26  ;;  %s2312_s28 = int_to_ptr.vmem [resolvable:$true] %s63_s28 }
   0x9   :  { %s1886_s14 = scalar_lea.hbm %s2705_s1, 16 }
   0xa   :  { %p1887_p0 = scmp.ne.s32.totalorder %s2705_s1, %s1886_s14  ;;  %p1890_p1 = scmp.lt.u32.totalorder %s1886_s14, %s2705_s1 }
   0xc   :  { %p1892_p2 = pnand %p1890_p1, %p1887_p0 }
   0xe   :  { %1895 = shalt.err (!%p1892_p2)
}
   0xf   :  { %s1896_s19 = scalar_lea.vmem %s45_s26, 16  ;;  %s1900_s20 = scalar_lea.vmem %s45_s26, 32 }
  0x10   :  { %p1897_p3 = scmp.ne.s32.totalorder %s45_s26, %s1896_s19  ;;  %p1901_p4 = scmp.lt.s32.totalorder %s45_s26, %s45_s26 }
  0x11   :  { %p1902_p5 = scmp.lt.s32.totalorder %s1900_s20, %s1896_s19 }
  0x13   :  { %p1903_p6 = por %p1902_p5, %p1901_p4 }
  0x15   :  { %p1904_p7 = pnand %p1903_p6, %p1897_p3 }
  0x17   :  { %1907 = shalt.err (!%p1904_p7)
}
  0x18   :  { %47 = dma.hbm_to_vmem [thread:$0]  %s2705_s1, 16, %s45_s26, [#allocation7]  }
  0x19   :  { %s1908_s25 = scalar_lea.hbm %s2707_s3, 256 }
  0x1a   :  { %p1909_p8 = scmp.ne.s32.totalorder %s2707_s3, %s1908_s25  ;;  %p1912_p9 = scmp.lt.u32.totalorder %s1908_s25, %s2707_s3 }
  0x1c   :  { %p1914_p10 = pnand %p1912_p9, %p1909_p8 }
  0x1e   :  { %1917 = shalt.err (!%p1914_p10)
}
  0x1f   :  { %s1918_s15 = scalar_lea.vmem %s2312_s28, 256  ;;  %p1923_p12 = scmp.lt.s32.totalorder %s2312_s28, %s2312_s28 }
  0x20   :  { %p1919_p11 = scmp.ne.s32.totalorder %s2312_s28, %s1918_s15  ;;  %p1924_p13 = scmp.lt.s32.totalorder %s1918_s15, %s1918_s15 }
  0x22   :  { %p1925_p0 = por %p1924_p13, %p1923_p12 }
  0x24   :  { %p1926_p1 = pnand %p1925_p0, %p1919_p11 }
  0x26   :  { %1929 = shalt.err (!%p1926_p1)
}
  0x27   :  { %s2212_s1 = smov 64   ;;  %s2213_s26 = smov 4  }
  0x28   :  { %69 = dma.hbm_to_vmem [thread:$0]  %s2707_s3, 256, %s2312_s28, [#allocation10], %s2212_s1, %s2212_s1, %s2213_s26  }
  0x29   :  { %s2214_s18 = smov [#allocation12]   ;;  %s2215_s20 = smov [#allocation15]  }
  0x2a   :  { %s85_s19 = sshll.u32 %s2214_s18, 4  ;;  %s108_s21 = sshll.u32 %s2215_s20, 4  ;;  %s86_s19 = int_to_ptr.vmem [resolvable:$true] %s85_s19  ;;  %s109_s21 = int_to_ptr.vmem [resolvable:$true] %s108_s21 }
  0x2b   :  { %s1930_s24 = scalar_lea.hbm %s2709_s5, 256 }
  0x2c   :  { %p1931_p2 = scmp.ne.s32.totalorder %s2709_s5, %s1930_s24  ;;  %p1934_p3 = scmp.lt.u32.totalorder %s1930_s24, %s2709_s5 }
  0x2e   :  { %p1936_p4 = pnand %p1934_p3, %p1931_p2 }
  0x30   :  { %1939 = shalt.err (!%p1936_p4)
}
  0x31   :  { %s1940_s3 = scalar_lea.vmem %s86_s19, 256  ;;  %p1945_p6 = scmp.lt.s32.totalorder %s86_s19, %s86_s19 }
  0x32   :  { %p1941_p5 = scmp.ne.s32.totalorder %s86_s19, %s1940_s3  ;;  %p1946_p7 = scmp.lt.s32.totalorder %s1940_s3, %s1940_s3 }
  0x34   :  { %p1947_p8 = por %p1946_p7, %p1945_p6 }
  0x36   :  { %p1948_p9 = pnand %p1947_p8, %p1941_p5 }
  0x38   :  { %1951 = shalt.err (!%p1948_p9)
}
  0x39   :  { %91 = dma.hbm_to_vmem [thread:$0]  %s2709_s5, 256, %s86_s19, [#allocation13], %s2212_s1, %s2212_s1, %s2213_s26  }
  0x3a   :  { %s1952_s17 = scalar_lea.hbm %s2711_s7, 16 }
  0x3b   :  { %p1953_p10 = scmp.ne.s32.totalorder %s2711_s7, %s1952_s17  ;;  %p1956_p11 = scmp.lt.u32.totalorder %s1952_s17, %s2711_s7 }
  0x3d   :  { %p1958_p12 = pnand %p1956_p11, %p1953_p10 }
  0x3f   :  { %1961 = shalt.err (!%p1958_p12)
}
  0x40   :  { %s1962_s24 = scalar_lea.vmem %s109_s21, 16  ;;  %s1966_s25 = scalar_lea.vmem %s109_s21, 32 }
  0x41   :  { %p1963_p13 = scmp.ne.s32.totalorder %s109_s21, %s1962_s24  ;;  %p1967_p0 = scmp.lt.s32.totalorder %s109_s21, %s109_s21 }
  0x42   :  { %p1968_p1 = scmp.lt.s32.totalorder %s1966_s25, %s1962_s24 }
  0x44   :  { %p1969_p2 = por %p1968_p1, %p1967_p0 }
  0x46   :  { %p1970_p3 = pnand %p1969_p2, %p1963_p13 }
  0x48   :  { %1973 = shalt.err (!%p1970_p3)
}
  0x49   :  { %111 = dma.hbm_to_vmem [thread:$0]  %s2711_s7, 16, %s109_s21, [#allocation16]  }
  0x4a   :  { %s2216_s27 = smov [#allocation18]   ;;  %s2217_s30 = smov [#allocation21]  }
  0x4b   :  { %s127_s29 = sshll.u32 %s2216_s27, 4  ;;  %s149_s3 = sshll.u32 %s2217_s30, 4  ;;  %s128_s29 = int_to_ptr.vmem [resolvable:$true] %s127_s29  ;;  %s2373_s3 = int_to_ptr.vmem [resolvable:$true] %s149_s3 }
  0x4c   :  { %s1974_s15 = scalar_lea.hbm %s2713_s9, 256 }
  0x4d   :  { %p1975_p4 = scmp.ne.s32.totalorder %s2713_s9, %s1974_s15  ;;  %p1978_p5 = scmp.lt.u32.totalorder %s1974_s15, %s2713_s9 }
  0x4f   :  { %p1980_p6 = pnand %p1978_p5, %p1975_p4 }
  0x51   :  { %1983 = shalt.err (!%p1980_p6)
}
  0x52   :  { %s1984_s7 = scalar_lea.vmem %s128_s29, 256  ;;  %p1989_p8 = scmp.lt.s32.totalorder %s128_s29, %s128_s29 }
  0x53   :  { %p1985_p7 = scmp.ne.s32.totalorder %s128_s29, %s1984_s7  ;;  %p1990_p9 = scmp.lt.s32.totalorder %s1984_s7, %s1984_s7 }
  0x55   :  { %p1991_p10 = por %p1990_p9, %p1989_p8 }
  0x57   :  { %p1992_p11 = pnand %p1991_p10, %p1985_p7 }
  0x59   :  { %1995 = shalt.err (!%p1992_p11)
}
  0x5a   :  { %133 = dma.hbm_to_vmem [thread:$0]  %s2713_s9, 256, %s128_s29, [#allocation19], %s2212_s1, %s2212_s1, %s2213_s26  }
  0x5b   :  { %s1996_s25 = scalar_lea.hbm %s2715_s11, 1024 }
  0x5c   :  { %p1997_p12 = scmp.ne.s32.totalorder %s2715_s11, %s1996_s25  ;;  %p2000_p13 = scmp.lt.u32.totalorder %s1996_s25, %s2715_s11 }
  0x5e   :  { %p2002_p0 = pnand %p2000_p13, %p1997_p12 }
  0x60   :  { %2005 = shalt.err (!%p2002_p0)
}
  0x61   :  { %s2006_s28 = scalar_lea.vmem %s2373_s3, 1024  ;;  %p2011_p2 = scmp.lt.s32.totalorder %s2373_s3, %s2373_s3 }
  0x62   :  { %p2007_p1 = scmp.ne.s32.totalorder %s2373_s3, %s2006_s28  ;;  %p2012_p3 = scmp.lt.s32.totalorder %s2006_s28, %s2006_s28 }
  0x64   :  { %p2013_p4 = por %p2012_p3, %p2011_p2 }
  0x66   :  { %p2014_p5 = pnand %p2013_p4, %p2007_p1 }
  0x68   :  { %2017 = shalt.err (!%p2014_p5)
}
  0x69   :  { %155 = dma.hbm_to_vmem [thread:$0]  %s2715_s11, 1024, %s2373_s3, [#allocation22], %s2212_s1, %s2212_s1, %s2213_s26  }
  0x6a   :  { %s2218_s14 = smov [#allocation3]   ;;  %s2018_s18 = scalar_lea.hbm %s2704_s0, 256 }
  0x6b   :  { %s31_s15 = sshll.u32 %s2218_s14, 4  ;;  %p2019_p6 = scmp.ne.s32.totalorder %s2704_s0, %s2018_s18  ;;  %s32_s15 = int_to_ptr.vmem [resolvable:$true] %s31_s15 }
  0x6c   :  { %p2022_p7 = scmp.lt.u32.totalorder %s2018_s18, %s2704_s0 }
  0x6e   :  { %p2024_p8 = pnand %p2022_p7, %p2019_p6 }
  0x70   :  { %2027 = shalt.err (!%p2024_p8)
}
  0x71   :  { %s2028_s23 = scalar_lea.vmem %s32_s15, 256  ;;  %p2033_p10 = scmp.lt.s32.totalorder %s32_s15, %s32_s15 }
  0x72   :  { %p2029_p9 = scmp.ne.s32.totalorder %s32_s15, %s2028_s23  ;;  %p2034_p11 = scmp.lt.s32.totalorder %s2028_s23, %s2028_s23 }
  0x74   :  { %p2035_p12 = por %p2034_p11, %p2033_p10 }
  0x76   :  { %p2036_p13 = pnand %p2035_p12, %p2029_p9 }
  0x78   :  { %2039 = shalt.err (!%p2036_p13)
}
  0x79   :  { %s2219_s11 = smov 128   ;;  %s2220_s26 = smov 8  }
  0x7a   :  { %37 = dma.hbm_to_vmem [thread:$0]  %s2704_s0, 256, %s32_s15, [#allocation4], %s2219_s11, %s2219_s11, %s2220_s26  }
  0x7b   :  { %s2221_s25 = smov [#allocation8]   ;;  %s2222_s19 = smov [#allocation11]  }
  0x7c   :  { %s54_s5 = sshll.u32 %s2221_s25, 4  ;;  %s76_s27 = sshll.u32 %s2222_s19, 4  ;;  %s55_s5 = int_to_ptr.vmem [resolvable:$true] %s54_s5  ;;  %s77_s27 = int_to_ptr.vmem [resolvable:$true] %s76_s27 }
  0x7d   :  { %s2040_s9 = scalar_lea.hbm %s2706_s2, 16 }
  0x7e   :  { %p2041_p0 = scmp.ne.s32.totalorder %s2706_s2, %s2040_s9  ;;  %p2044_p1 = scmp.lt.u32.totalorder %s2040_s9, %s2706_s2 }
  0x80   :  { %p2046_p2 = pnand %p2044_p1, %p2041_p0 }
  0x82   :  { %2049 = shalt.err (!%p2046_p2)
}
  0x83   :  { %s2050_s0 = scalar_lea.vmem %s55_s5, 16  ;;  %s2054_s15 = scalar_lea.vmem %s55_s5, 32 }
  0x84   :  { %p2051_p3 = scmp.ne.s32.totalorder %s55_s5, %s2050_s0  ;;  %p2055_p4 = scmp.lt.s32.totalorder %s55_s5, %s55_s5 }
  0x85   :  { %p2056_p5 = scmp.lt.s32.totalorder %s2054_s15, %s2050_s0 }
  0x87   :  { %p2057_p6 = por %p2056_p5, %p2055_p4 }
  0x89   :  { %p2058_p7 = pnand %p2057_p6, %p2051_p3 }
  0x8b   :  { %2061 = shalt.err (!%p2058_p7)
}
  0x8c   :  { %57 = dma.hbm_to_vmem [thread:$0]  %s2706_s2, 16, %s55_s5, [#allocation7]  }
  0x8d   :  { %s2062_s22 = scalar_lea.hbm %s2708_s4, 16 }
  0x8e   :  { %p2063_p8 = scmp.ne.s32.totalorder %s2708_s4, %s2062_s22  ;;  %p2066_p9 = scmp.lt.u32.totalorder %s2062_s22, %s2708_s4 }
  0x90   :  { %p2068_p10 = pnand %p2066_p9, %p2063_p8 }
  0x92   :  { %2071 = shalt.err (!%p2068_p10)
}
  0x93   :  { %s2072_s19 = scalar_lea.vmem %s77_s27, 16  ;;  %s2076_s30 = scalar_lea.vmem %s77_s27, 32 }
  0x94   :  { %p2073_p11 = scmp.ne.s32.totalorder %s77_s27, %s2072_s19  ;;  %p2077_p12 = scmp.lt.s32.totalorder %s77_s27, %s77_s27 }
  0x95   :  { %p2078_p13 = scmp.lt.s32.totalorder %s2076_s30, %s2072_s19 }
  0x97   :  { %p2079_p0 = por %p2078_p13, %p2077_p12 }
  0x99   :  { %p2080_p1 = pnand %p2079_p0, %p2073_p11 }
  0x9b   :  { %2083 = shalt.err (!%p2080_p1)
}
  0x9c   :  { %79 = dma.hbm_to_vmem [thread:$0]  %s2708_s4, 16, %s77_s27, [#allocation10]  }
  0x9d   :  { %s2223_s28 = smov [#allocation14]   ;;  %s2224_s29 = smov [#allocation17]  }
  0x9e   :  { %s98_s9 = sshll.u32 %s2223_s28, 4  ;;  %s118_s14 = sshll.u32 %s2224_s29, 4  ;;  %s99_s9 = int_to_ptr.vmem [resolvable:$true] %s98_s9  ;;  %s119_s14 = int_to_ptr.vmem [resolvable:$true] %s118_s14 }
  0x9f   :  { %s2084_s0 = scalar_lea.hbm %s2710_s6, 16 }
  0xa0   :  { %p2085_p2 = scmp.ne.s32.totalorder %s2710_s6, %s2084_s0  ;;  %p2088_p3 = scmp.lt.u32.totalorder %s2084_s0, %s2710_s6 }
  0xa2   :  { %p2090_p4 = pnand %p2088_p3, %p2085_p2 }
  0xa4   :  { %2093 = shalt.err (!%p2090_p4)
}
  0xa5   :  { %s2094_s4 = scalar_lea.vmem %s99_s9, 16  ;;  %s2098_s27 = scalar_lea.vmem %s99_s9, 32 }
  0xa6   :  { %p2095_p5 = scmp.ne.s32.totalorder %s99_s9, %s2094_s4  ;;  %p2099_p6 = scmp.lt.s32.totalorder %s99_s9, %s99_s9 }
  0xa7   :  { %p2100_p7 = scmp.lt.s32.totalorder %s2098_s27, %s2094_s4 }
  0xa9   :  { %p2101_p8 = por %p2100_p7, %p2099_p6 }
  0xab   :  { %p2102_p9 = pnand %p2101_p8, %p2095_p5 }
  0xad   :  { %2105 = shalt.err (!%p2102_p9)
}
  0xae   :  { %101 = dma.hbm_to_vmem [thread:$0]  %s2710_s6, 16, %s99_s9, [#allocation13]  }
  0xaf   :  { %s2106_s24 = scalar_lea.hbm %s2712_s8, 16 }
  0xb0   :  { %p2107_p10 = scmp.ne.s32.totalorder %s2712_s8, %s2106_s24  ;;  %p2110_p11 = scmp.lt.u32.totalorder %s2106_s24, %s2712_s8 }
  0xb2   :  { %p2112_p12 = pnand %p2110_p11, %p2107_p10 }
  0xb4   :  { %2115 = shalt.err (!%p2112_p12)
}
  0xb5   :  { %s2116_s5 = scalar_lea.vmem %s119_s14, 16  ;;  %s2120_s28 = scalar_lea.vmem %s119_s14, 32 }
  0xb6   :  { %p2117_p13 = scmp.ne.s32.totalorder %s119_s14, %s2116_s5  ;;  %p2121_p0 = scmp.lt.s32.totalorder %s119_s14, %s119_s14 }
  0xb7   :  { %p2122_p1 = scmp.lt.s32.totalorder %s2120_s28, %s2116_s5 }
  0xb9   :  { %p2123_p2 = por %p2122_p1, %p2121_p0 }
  0xbb   :  { %p2124_p3 = pnand %p2123_p2, %p2117_p13 }
  0xbd   :  { %2127 = shalt.err (!%p2124_p3)
}
  0xbe   :  { %121 = dma.hbm_to_vmem [thread:$0]  %s2712_s8, 16, %s119_s14, [#allocation16]  }
  0xbf   :  { %s2225_s29 = smov [#allocation20]   ;;  %s2226_s17 = smov [#allocation23]  }
  0xc0   :  { %s140_s16 = sshll.u32 %s2225_s29, 4  ;;  %s162_s0 = sshll.u32 %s2226_s17, 4  ;;  %s141_s16 = int_to_ptr.vmem [resolvable:$true] %s140_s16  ;;  %s163_s0 = int_to_ptr.vmem [resolvable:$true] %s162_s0 }
  0xc1   :  { %s2128_s20 = scalar_lea.hbm %s2714_s10, 16 }
  0xc2   :  { %p2129_p4 = scmp.ne.s32.totalorder %s2714_s10, %s2128_s20  ;;  %p2132_p5 = scmp.lt.u32.totalorder %s2128_s20, %s2714_s10 }
  0xc4   :  { %p2134_p6 = pnand %p2132_p5, %p2129_p4 }
  0xc6   :  { %2137 = shalt.err (!%p2134_p6)
}
  0xc7   :  { %s2138_s8 = scalar_lea.vmem %s141_s16, 16  ;;  %s2142_s14 = scalar_lea.vmem %s141_s16, 32 }
  0xc8   :  { %p2139_p7 = scmp.ne.s32.totalorder %s141_s16, %s2138_s8  ;;  %p2143_p8 = scmp.lt.s32.totalorder %s141_s16, %s141_s16 }
  0xc9   :  { %p2144_p9 = scmp.lt.s32.totalorder %s2142_s14, %s2138_s8 }
  0xcb   :  { %p2145_p10 = por %p2144_p9, %p2143_p8 }
  0xcd   :  { %p2146_p11 = pnand %p2145_p10, %p2139_p7 }
  0xcf   :  { %2149 = shalt.err (!%p2146_p11)
}
  0xd0   :  { %143 = dma.hbm_to_vmem [thread:$0]  %s2714_s10, 16, %s141_s16, [#allocation19]  }
  0xd1   :  { %s2150_s25 = scalar_lea.hbm %s2716_s12, 16 }
  0xd2   :  { %p2151_p12 = scmp.ne.s32.totalorder %s2716_s12, %s2150_s25  ;;  %p2154_p13 = scmp.lt.u32.totalorder %s2150_s25, %s2716_s12 }
  0xd4   :  { %p2156_p0 = pnand %p2154_p13, %p2151_p12 }
  0xd6   :  { %2159 = shalt.err (!%p2156_p0)
}
  0xd7   :  { %s2160_s28 = scalar_lea.vmem %s163_s0, 16  ;;  %s2164_s6 = scalar_lea.vmem %s163_s0, 32 }
  0xd8   :  { %p2161_p1 = scmp.ne.s32.totalorder %s163_s0, %s2160_s28  ;;  %p2165_p2 = scmp.lt.s32.totalorder %s163_s0, %s163_s0 }
  0xd9   :  { %p2166_p3 = scmp.lt.s32.totalorder %s2164_s6, %s2160_s28 }
  0xdb   :  { %p2167_p4 = por %p2166_p3, %p2165_p2 }
  0xdd   :  { %p2168_p5 = pnand %p2167_p4, %p2161_p1 }
  0xdf   :  { %2171 = shalt.err (!%p2168_p5)
}
  0xe0   :  { %165 = dma.hbm_to_vmem [thread:$0]  %s2716_s12, 16, %s163_s0, [#allocation22]  }
  0xe1   :  { %2194 = dma.done.wait [#allocation4], 256  }
  0xe2   :  { %2195 = vsyncadd [#allocation4], 4294967040 }
  0xe3   :  { %2196 = dma.done.wait [#allocation7], 32  }
  0xe4   :  { %2197 = vsyncadd [#allocation7], 4294967264 }
  0xe5   :  { %2198 = dma.done.wait [#allocation10], 272  }
  0xe6   :  { %2199 = vsyncadd [#allocation10], 4294967024 }
  0xe7   :  { %2200 = dma.done.wait [#allocation13], 272  }
  0xe8   :  { %2201 = vsyncadd [#allocation13], 4294967024 }
  0xe9   :  { %2202 = dma.done.wait [#allocation16], 32  }
  0xea   :  { %2203 = vsyncadd [#allocation16], 4294967264 }
  0xeb   :  { %2204 = dma.done.wait [#allocation19], 272  }
  0xec   :  { %2205 = vsyncadd [#allocation19], 4294967024 }
  0xed   :  { %2206 = dma.done.wait [#allocation22], 1040  }
  0xee   :  { %2207 = vsyncadd [#allocation22], 4294966256  ;;  %vm210_vm0 = vcmask 261120   ;;  %v2497_v0 = vld [vmem:[#allocation3] sm:$0xff]  ;;  %v2499_v1 = vld [vmem:[#allocation3 + $0x8] sm:$0xff]  ;;  %v2227_v15 = vmov 0.0  }
  0xef   :  { %v211_v2 = vsel %vm210_vm0, %v2497_v0, 0.0  ;;  %v214_v3 = vsel %vm210_vm0, %v2499_v1, 0.0  ;;  %v1828_v14 = vld [vmem:[#allocation9] sm:$0xff]   ;;  %1656 = vmatprep.subr.bf16.mxu0 %v2227_v15  ;;  %1676 = vmatprep.subr.bf16.mxu1 %v2227_v15  ;;  %v1829_v16 = vld [vmem:[#allocation9 + $0x8] sm:$0xff]   ;;  %vm2228_vm1 = vmmov 0   ;;  %s2229_s12 = smov 96  }
  0xf0   :  { %212 = vadd.xlane.f32.xlu0 %v211_v2  ;;  %1657 = vmatpush3.bf16.msra.mxu0 %v1828_v14  ;;  %v1561_v25 = vld [vmem:[#allocation6] ss:$0 sm:$0xff]  ;;  %v1562_v29 = vld [vmem:[#allocation8] ss:$0 sm:$0xff]  ;;  %v1563_v34 = vld [vmem:[#allocation11] ss:$0 sm:$0xff] }
  0xf1   :  { %1660 = vmatprep.mubr.msk.bf16.mxu0 %vm2228_vm1, %v2227_v15  ;;  %1658 = vmatprep.subr.bf16.mxu0 %v2227_v15  ;;  %vm330_vm2 = vcmask 64512   ;;  %s2230_s29 = smov 88   ;;  %vm454_vm3 = vcmask 1043456   ;;  %s2231_s16 = smov 120   ;;  %vm773_vm4 = vcmask 130112   ;;  %vm1000_vm5 = vcmask 195712  }
  0xf2   :  { %1678 = vmatprep.mubr.msk.bf16.mxu1 %vm2228_vm1, %v2227_v15  ;;  %s2233_s17 = smov 80   ;;  %s2234_s0 = smov 112   ;;  %vm1227_vm6 = vcmask 261312  }
  0xf3   :  { %s2235_s15 = smov 48   ;;  %s2236_s18 = smov 72  }
  0xf4   :  { %215 = vadd.xlane.f32.xlu0 %v214_v3  ;;  %1659 = vmatpush3.bf16.msra.mxu0 %v1829_v16  ;;  %s2237_s20 = smov 104   ;;  %s2238_s7 = smov 40  }
  0xf5   :  { %1664 = vmatprep.subr.bf16.mxu0 %v2227_v15  ;;  %s2239_s4 = smov 16   ;;  %s2240_s27 = smov 24  }
  0xf6   :  { %s2241_s21 = smov [#allocation24]  }
  0xf7   :  { %s1543_s8 = sshll.u32 %s2241_s21, 4  ;;  %s1544_s8 = int_to_ptr.vmem [resolvable:$true] %s1543_s8 }
  0xf8   :  { %s2172_s14 = scalar_lea.vmem %s1544_s8, 256  ;;  %p2177_p7 = scmp.lt.s32.totalorder %s1544_s8, %s1544_s8 }
  0xf9   :  { %p2173_p6 = scmp.ne.s32.totalorder %s1544_s8, %s2172_s14  ;;  %p2178_p8 = scmp.lt.s32.totalorder %s2172_s14, %s2172_s14 }
  0xfb   :  { %p2179_p9 = por %p2178_p8, %p2177_p7 }
  0xfd   :  { %p2180_p10 = pnand %p2179_p9, %p2173_p6 }
 0x17d   :  { %v213_v4 = vpop.xlane.xlu0 %212 }
 0x17e   :  { %v218_v5 = vmul.f32 0.03125, %v213_v4 }
 0x180   :  { %v220_v6 = vsub.f32 %v2497_v0, %v218_v5 }
 0x181   :  { %v216_v7 = vpop.xlane.xlu0 %215 }
 0x182   :  { %v219_v8 = vmul.f32 0.03125, %v216_v7  ;;  %v222_v9 = vmul.f32 %v220_v6, %v220_v6 }
 0x184   :  { %v221_v10 = vsub.f32 %v2499_v1, %v219_v8  ;;  %v224_v11 = vsel %vm210_vm0, %v222_v9, 0.0 }
 0x185   :  { %225 = vadd.xlane.f32.xlu1 %v224_v11 }
 0x186   :  { %v223_v12 = vmul.f32 %v221_v10, %v221_v10 }
 0x188   :  { %v227_v13 = vsel %vm210_vm0, %v223_v12, 0.0 }
 0x189   :  { %228 = vadd.xlane.f32.xlu1 %v227_v13 }
 0x212   :  { %v226_v17 = vpop.xlane.xlu1 %225 }
 0x213   :  { %v230_v18 = vmul.f32 0.03125, %v226_v17 }
 0x215   :  { %v232_v19 = vadd.f32 1e-05, %v230_v18 }
 0x216   :  { %v229_v20 = vpop.xlane.xlu1 %228 }
 0x217   :  { %1842 = vrsqrt.f32 %v232_v19  ;;  %v231_v21 = vmul.f32 0.03125, %v229_v20 }
 0x219   :  { %v233_v22 = vadd.f32 1e-05, %v231_v21 }
 0x21b   :  { %1844 = vrsqrt.f32 %v233_v22 }
 0x221   :  { %v1843_v23 = vpop.eup %1842 }
 0x222   :  { %v236_v24 = vmul.f32 %v1843_v23, %v220_v6 }
 0x224   :  { %v244_v28 = vmul.f32 %v1561_v25, %v236_v24 }
 0x225   :  { %v1845_v26 = vpop.eup %1844 }
 0x226   :  { %v237_v27 = vmul.f32 %v1845_v26, %v221_v10  ;;  %v252_v31 = vadd.f32 %v1562_v29, %v244_v28 }
 0x228   :  { %v245_v30 = vmul.f32 %v1561_v25, %v237_v27 }
 0x22a   :  { %v253_v32 = vadd.f32 %v1562_v29, %v245_v30 }
 0x22c   :  { %v254_v33 = vpack.c.bf16 %v253_v32, %v252_v31 }
 0x22e   :  { %1661 = vmatmul.mubr.msk.bf16.vlgmr.msra.gmra.mrb[0].mxu0 %vm210_vm0, %v254_v33 }
 0x22f   :  { %1666 = vmatprep.mubr.msk.bf16.mxu0 %vm2228_vm1, %v2227_v15 }
 0x301   :  { %v315_v35 = vpop.f32.mrb[0].mxu0 }
 0x302   :  { %v316_v36 = vadd.f32 %v1563_v34, %v315_v35  ;;  %v1662_v37 = vpop.f32.mrb[1].mxu0 }
 0x303   :  { %v318_v38 = vpop.f32.mrb[2].mxu0 }
 0x304   :  { %v2520_v39 = vpack.c.bf16 %v316_v36, %v316_v36  ;;  %v319_v40 = vadd.f32 %v1563_v34, %v318_v38  ;;  %v1663_v41 = vpop.f32.mrb[3].mxu0 }
 0x306   :  { %v2522_v42 = vpack.c.bf16 %v319_v40, %v319_v40  ;;  %328 = vrot.lane.b32.xlu0 %v2520_v39, %s2229_s12 }
 0x308   :  { %377 = vrot.lane.b32.xlu1 %v2522_v42, %s2229_s12 }
 0x378   :  { %v329_v43 = vpop.permute.xlu0 %328 }
 0x379   :  { %v335_v44 = vsel %vm330_vm2, %v329_v43, 0 }
 0x37a   :  { %1665 = vmatpush3.bf16.xpose.msra.mxu0 %v335_v44  ;;  %v378_v45 = vpop.permute.xlu1 %377 }
 0x37b   :  { %1670 = vmatprep.subr.bf16.mxu0 %v2227_v15  ;;  %v383_v46 = vsel %vm330_vm2, %v378_v45, 0 }
 0x381   :  { %1667 = vmatmul.mubr.msk.bf16.vlgmr.msra.gmra.mrb[4].mxu0 %vm330_vm2, %v2520_v39 }
 0x382   :  { %1671 = vmatpush3.bf16.xpose.msra.mxu0 %v383_v46  ;;  %1672 = vmatprep.mubr.msk.bf16.mxu0 %vm2228_vm1, %v2227_v15 }
 0x383   :  { %1682 = vmatprep.subr.bf16.mxu0 %v2227_v15 }
 0x389   :  { %1673 = vmatmul.mubr.msk.bf16.vlgmr.msra.gmra.mrb[8].mxu0 %vm330_vm2, %v2522_v42 }
 0x38a   :  { %1684 = vmatprep.mubr.msk.bf16.mxu0 %vm2228_vm1, %v2227_v15 }
 0x454   :  { %v371_v47 = vpop.f32.mrb[4].mxu0 }
 0x455   :  { %v1668_v48 = vpop.f32.mrb[5].mxu0  ;;  %v425_v49 = vsel %vm330_vm2, %v371_v47, -inf }
 0x456   :  { %426 = vmax.xlane.f32.xlu1 %v425_v49  ;;  %v374_v50 = vpop.f32.mrb[6].mxu0 }
 0x457   :  { %v1669_v51 = vpop.f32.mrb[7].mxu0 }
 0x45c   :  { %v419_v52 = vpop.f32.mrb[8].mxu0 }
 0x45d   :  { %v1674_v53 = vpop.f32.mrb[9].mxu0  ;;  %v428_v54 = vsel %vm330_vm2, %v419_v52, -inf }
 0x45e   :  { %429 = vmax.xlane.f32.xlu0 %v428_v54  ;;  %v422_v55 = vpop.f32.mrb[10].mxu0 }
 0x45f   :  { %v1675_v56 = vpop.f32.mrb[11].mxu0 }
 0x467   :  { %498 = vrot.lane.b32.xlu1 %v2522_v42, %s2212_s1 }
 0x46b   :  { %550 = vrot.lane.b32.xlu1 %v2520_v39, %s2230_s29 }
 0x4e3   :  { %v427_v57 = vpop.xlane.xlu1 %426 }
 0x4e4   :  { %v431_v58 = vsub.f32 %v371_v47, %v427_v57 }
 0x4e6   :  { %v433_v59 = vmul.f32 1.442695, %v431_v58 }
 0x4e7   :  { %v499_v60 = vpop.permute.xlu1 %498 }
 0x4e8   :  { %1846 = vpow2.f32 %v433_v59  ;;  %v504_v61 = vsel %vm454_vm3, %v499_v60, 0 }
 0x4e9   :  { %1683 = vmatpush3.bf16.msra.mxu0 %v504_v61 }
 0x4ea   :  { %1694 = vmatprep.subr.bf16.mxu0 %v2227_v15 }
 0x4eb   :  { %v430_v62 = vpop.xlane.xlu0 %429  ;;  %v551_v8 = vpop.permute.xlu1 %550 }
 0x4ec   :  { %v432_v63 = vsub.f32 %v419_v52, %v430_v62  ;;  %v556_v16 = vsel %vm330_vm2, %v551_v8, 0 }
 0x4ee   :  { %v435_v2 = vmul.f32 1.442695, %v432_v63 }
 0x4f0   :  { %1848 = vpow2.f32 %v435_v2 }
 0x4f2   :  { %v1847_v3 = vpop.eup %1846 }
 0x4f3   :  { %v437_v4 = vsel %vm330_vm2, %v1847_v3, 0.0 }
 0x4f4   :  { %438 = vadd.xlane.f32.xlu0 %v437_v4 }
 0x4fa   :  { %v1849_v5 = vpop.eup %1848 }
 0x4fb   :  { %v440_v6 = vsel %vm330_vm2, %v1849_v5, 0.0 }
 0x4fc   :  { %441 = vadd.xlane.f32.xlu1 %v440_v6 }
 0x50a   :  { %449 = vrot.lane.b32.xlu0 %v2520_v39, %s2212_s1  ;;  %s2232_s1 = smov 56  }
 0x50d   :  { %600 = vrot.lane.b32.xlu1 %v2522_v42, %s2230_s29 }
 0x50e   :  { %548 = vrot.lane.b32.xlu0 %v2520_v39, %s2231_s16 }
 0x511   :  { %598 = vrot.lane.b32.xlu1 %v2522_v42, %s2231_s16 }
 0x581   :  { %v439_v7 = vpop.xlane.xlu0 %438 }
 0x582   :  { %1850 = vrcp.f32 %v439_v7 }
 0x585   :  { %v450_v9 = vpop.permute.xlu0 %449 }
 0x586   :  { %v456_v10 = vsel %vm454_vm3, %v450_v9, 0 }
 0x587   :  { %1677 = vmatpush3.bf16.msra.mxu1 %v456_v10 }
 0x588   :  { %1688 = vmatprep.subr.bf16.mxu1 %v2227_v15 }
 0x589   :  { %v442_v11 = vpop.xlane.xlu1 %441  ;;  %v549_v21 = vpop.permute.xlu0 %548 }
 0x58a   :  { %1852 = vrcp.f32 %v442_v11 }
 0x58c   :  { %v1851_v12 = vpop.eup %1850 }
 0x58d   :  { %v445_v13 = vmul.f32 %v1851_v12, %v1847_v3  ;;  %v601_v19 = vpop.permute.xlu1 %600 }
 0x58e   :  { %v606_v22 = vsel %vm330_vm2, %v601_v19, 0 }
 0x58f   :  { %v447_v14 = vpack.c.bf16 %v445_v13, %v445_v13 }
 0x591   :  { %1679 = vmatmul.mubr.msk.bf16.vlgmr.msra.gmra.mrb[0].mxu1 %vm330_vm2, %v447_v14  ;;  %v599_v23 = vpop.permute.xlu1 %598 }
 0x592   :  { %1689 = vmatpush3.bf16.xpose.msra.mxu1 %v556_v16  ;;  %1690 = vmatprep.mubr.msk.bf16.mxu1 %vm2228_vm1, %v2227_v15 }
 0x593   :  { %1700 = vmatprep.subr.bf16.mxu1 %v2227_v15 }
 0x594   :  { %v1853_v17 = vpop.eup %1852 }
 0x595   :  { %v446_v18 = vmul.f32 %v1853_v17, %v1849_v5 }
 0x597   :  { %v448_v20 = vpack.c.bf16 %v446_v18, %v446_v18 }
 0x599   :  { %1685 = vmatmul.mubr.msk.bf16.vlgmr.msra.gmra.mrb[12].mxu0 %vm330_vm2, %v448_v20  ;;  %1691 = vmatmul.mubr.msk.bf16.vlgmr.msra.gmra.mrb[4].mxu1 %vm330_vm2, %v549_v21 }
 0x59a   :  { %1695 = vmatpush3.bf16.xpose.msra.mxu0 %v606_v22  ;;  %1696 = vmatprep.mubr.msk.bf16.mxu0 %vm2228_vm1, %v2227_v15 }
 0x59b   :  { %1706 = vmatprep.subr.bf16.mxu0 %v2227_v15  ;;  %1702 = vmatprep.mubr.msk.bf16.mxu1 %vm2228_vm1, %v2227_v15 }
 0x5a1   :  { %1697 = vmatmul.mubr.msk.bf16.vlgmr.msra.gmra.mrb[16].mxu0 %vm330_vm2, %v599_v23 }
 0x5a2   :  { %1708 = vmatprep.mubr.msk.bf16.mxu0 %vm2228_vm1, %v2227_v15 }
 0x664   :  { %v492_v24 = vpop.f32.mrb[0].mxu1 }
 0x665   :  { %v1680_v25 = vpop.f32.mrb[1].mxu1 }
 0x666   :  { %v495_v26 = vpop.f32.mrb[2].mxu1 }
 0x667   :  { %v1681_v27 = vpop.f32.mrb[3].mxu1 }
 0x66c   :  { %v540_v28 = vpop.f32.mrb[12].mxu0  ;;  %v592_v29 = vpop.f32.mrb[4].mxu1 }
 0x66d   :  { %v546_v30 = vpack.c.bf16 %v540_v28, %v492_v24  ;;  %v1686_v31 = vpop.f32.mrb[13].mxu0  ;;  %v1692_v32 = vpop.f32.mrb[5].mxu1  ;;  %v648_v33 = vsel %vm330_vm2, %v592_v29, -inf }
 0x66e   :  { %649 = vmax.xlane.f32.xlu0 %v648_v33  ;;  %v543_v34 = vpop.f32.mrb[14].mxu0  ;;  %v595_v35 = vpop.f32.mrb[6].mxu1 }
 0x66f   :  { %547 = vst.msk [vmem:[#allocation2] sm:$0xff] %vm330_vm2, %v546_v30  ;;  %v1687_v36 = vpop.f32.mrb[15].mxu0  ;;  %v1693_v37 = vpop.f32.mrb[7].mxu1 }
 0x674   :  { %v642_v38 = vpop.f32.mrb[16].mxu0 }
 0x675   :  { %v1698_v40 = vpop.f32.mrb[17].mxu0  ;;  %v651_v41 = vsel %vm330_vm2, %v642_v38, -inf }
 0x676   :  { %652 = vmax.xlane.f32.xlu1 %v651_v41  ;;  %v645_v43 = vpop.f32.mrb[18].mxu0 }
 0x677   :  { %v1699_v44 = vpop.f32.mrb[19].mxu0 }
 0x687   :  { %720 = vrot.lane.b32.xlu1 %v2522_v42, %s2232_s1 }
 0x68b   :  { %777 = vrot.lane.b32.xlu1 %v2520_v39, %s2233_s17 }
 0x68f   :  { %827 = vrot.lane.b32.xlu1 %v2522_v42, %s2233_s17 }
 0x693   :  { %825 = vrot.lane.b32.xlu1 %v2522_v42, %s2234_s0 }
 0x6fb   :  { %v650_v45 = vpop.xlane.xlu0 %649 }
 0x6fc   :  { %v654_v46 = vsub.f32 %v592_v29, %v650_v45 }
 0x6fe   :  { %v656_v47 = vmul.f32 1.442695, %v654_v46 }
 0x700   :  { %1854 = vpow2.f32 %v656_v47 }
 0x703   :  { %v653_v48 = vpop.xlane.xlu1 %652 }
 0x704   :  { %v655_v49 = vsub.f32 %v642_v38, %v653_v48 }
 0x706   :  { %v658_v50 = vmul.f32 1.442695, %v655_v49 }
 0x707   :  { %v721_v51 = vpop.permute.xlu1 %720 }
 0x708   :  { %1856 = vpow2.f32 %v658_v50  ;;  %v726_v52 = vsel %vm454_vm3, %v721_v51, 0 }
 0x709   :  { %1707 = vmatpush3.bf16.msra.mxu0 %v726_v52 }
 0x70a   :  { %v1855_v53 = vpop.eup %1854  ;;  %1718 = vmatprep.subr.bf16.mxu0 %v2227_v15 }
 0x70b   :  { %v660_v54 = vsel %vm330_vm2, %v1855_v53, 0.0  ;;  %v778_v2 = vpop.permute.xlu1 %777 }
 0x70c   :  { %661 = vadd.xlane.f32.xlu0 %v660_v54  ;;  %v783_v6 = vsel %vm330_vm2, %v778_v2, 0 }
 0x70f   :  { %v828_v5 = vpop.permute.xlu1 %827 }
 0x710   :  { %v833_v8 = vsel %vm330_vm2, %v828_v5, 0 }
 0x712   :  { %v1857_v55 = vpop.eup %1856 }
 0x713   :  { %v663_v56 = vsel %vm330_vm2, %v1857_v55, 0.0  ;;  %v826_v10 = vpop.permute.xlu1 %825 }
 0x714   :  { %664 = vadd.xlane.f32.xlu0 %v663_v56 }
 0x72a   :  { %672 = vrot.lane.b32.xlu0 %v2520_v39, %s2232_s1 }
 0x72e   :  { %775 = vrot.lane.b32.xlu0 %v2520_v39, %s2234_s0 }
 0x799   :  { %v662_v57 = vpop.xlane.xlu0 %661 }
 0x79a   :  { %1858 = vrcp.f32 %v662_v57 }
 0x7a1   :  { %v665_v58 = vpop.xlane.xlu0 %664 }
 0x7a2   :  { %1860 = vrcp.f32 %v665_v58 }
 0x7a4   :  { %v1859_v59 = vpop.eup %1858 }
 0x7a5   :  { %v668_v60 = vmul.f32 %v1859_v59, %v1855_v53  ;;  %v673_v61 = vpop.permute.xlu0 %672 }
 0x7a6   :  { %v678_v62 = vsel %vm454_vm3, %v673_v61, 0 }
 0x7a7   :  { %1701 = vmatpush3.bf16.msra.mxu1 %v678_v62  ;;  %v670_v63 = vpack.c.bf16 %v668_v60, %v668_v60 }
 0x7a8   :  { %1712 = vmatprep.subr.bf16.mxu1 %v2227_v15 }
 0x7a9   :  { %v776_v9 = vpop.permute.xlu0 %775 }
 0x7aa   :  { %1703 = vmatmul.mubr.msk.bf16.vlgmr.msra.gmra.mrb[8].mxu1 %vm330_vm2, %v670_v63 }
 0x7ab   :  { %1714 = vmatprep.mubr.msk.bf16.mxu1 %vm2228_vm1, %v2227_v15 }
 0x7ac   :  { %v1861_v3 = vpop.eup %1860 }
 0x7ad   :  { %v669_v4 = vmul.f32 %v1861_v3, %v1857_v55 }
 0x7af   :  { %v671_v7 = vpack.c.bf16 %v669_v4, %v669_v4 }
 0x7b0   :  { %1713 = vmatpush3.bf16.xpose.msra.mxu1 %v783_v6 }
 0x7b1   :  { %1709 = vmatmul.mubr.msk.bf16.vlgmr.msra.gmra.mrb[20].mxu0 %vm330_vm2, %v671_v7  ;;  %1724 = vmatprep.subr.bf16.mxu1 %v2227_v15 }
 0x7b2   :  { %1719 = vmatpush3.bf16.xpose.msra.mxu0 %v833_v8  ;;  %1720 = vmatprep.mubr.msk.bf16.mxu0 %vm2228_vm1, %v2227_v15 }
 0x7b3   :  { %1730 = vmatprep.subr.bf16.mxu0 %v2227_v15 }
 0x7b7   :  { %1715 = vmatmul.mubr.msk.bf16.vlgmr.msra.gmra.mrb[12].mxu1 %vm330_vm2, %v776_v9 }
 0x7b8   :  { %1726 = vmatprep.mubr.msk.bf16.mxu1 %vm2228_vm1, %v2227_v15 }
 0x7b9   :  { %1721 = vmatmul.mubr.msk.bf16.vlgmr.msra.gmra.mrb[24].mxu0 %vm330_vm2, %v826_v10 }
 0x7ba   :  { %1732 = vmatprep.mubr.msk.bf16.mxu0 %vm2228_vm1, %v2227_v15 }
 0x87d   :  { %v2601_v11 = vpop.f32.mrb[8].mxu1 }
 0x87e   :  { %v1704_v12 = vpop.f32.mrb[9].mxu1 }
 0x87f   :  { %v717_v13 = vpop.f32.mrb[10].mxu1 }
 0x880   :  { %v1705_v14 = vpop.f32.mrb[11].mxu1 }
 0x884   :  { %v2603_v16 = vpop.f32.mrb[20].mxu0 }
 0x885   :  { %v768_v17 = vpack.c.bf16 %v2603_v16, %v2601_v11  ;;  %v1710_v18 = vpop.f32.mrb[21].mxu0 }
 0x886   :  { %v765_v19 = vpop.f32.mrb[22].mxu0 }
 0x887   :  { %v1711_v20 = vpop.f32.mrb[23].mxu0 }
 0x88a   :  { %v819_v21 = vpop.f32.mrb[12].mxu1 }
 0x88b   :  { %v1716_v22 = vpop.f32.mrb[13].mxu1  ;;  %v875_v23 = vsel %vm330_vm2, %v819_v21, -inf }
 0x88c   :  { %876 = vmax.xlane.f32.xlu0 %v875_v23  ;;  %v822_v24 = vpop.f32.mrb[14].mxu1  ;;  %v869_v25 = vpop.f32.mrb[24].mxu0 }
 0x88d   :  { %v1717_v26 = vpop.f32.mrb[15].mxu1  ;;  %v1722_v27 = vpop.f32.mrb[25].mxu0  ;;  %v878_v28 = vsel %vm330_vm2, %v869_v25, -inf }
 0x88e   :  { %879 = vmax.xlane.f32.xlu1 %v878_v28  ;;  %v872_v29 = vpop.f32.mrb[26].mxu0 }
 0x88f   :  { %v1723_v30 = vpop.f32.mrb[27].mxu0 }
 0x89f   :  { %947 = vrot.lane.b32.xlu1 %v2522_v42, %s2235_s15 }
 0x8a3   :  { %1004 = vrot.lane.b32.xlu1 %v2520_v39, %s2236_s18 }
 0x8a7   :  { %1054 = vrot.lane.b32.xlu1 %v2522_v42, %s2236_s18 }
 0x8ab   :  { %1052 = vrot.lane.b32.xlu1 %v2522_v42, %s2237_s20 }
 0x919   :  { %v877_v31 = vpop.xlane.xlu0 %876 }
 0x91a   :  { %v881_v32 = vsub.f32 %v819_v21, %v877_v31 }
 0x91b   :  { %v880_v33 = vpop.xlane.xlu1 %879 }
 0x91c   :  { %v883_v34 = vmul.f32 1.442695, %v881_v32  ;;  %v882_v35 = vsub.f32 %v869_v25, %v880_v33 }
 0x91e   :  { %1862 = vpow2.f32 %v883_v34  ;;  %v885_v36 = vmul.f32 1.442695, %v882_v35 }
 0x91f   :  { %v948_v37 = vpop.permute.xlu1 %947 }
 0x920   :  { %1864 = vpow2.f32 %v885_v36  ;;  %v953_v38 = vsel %vm454_vm3, %v948_v37, 0 }
 0x921   :  { %1731 = vmatpush3.bf16.msra.mxu0 %v953_v38 }
 0x922   :  { %1742 = vmatprep.subr.bf16.mxu0 %v2227_v15 }
 0x923   :  { %v1005_v50 = vpop.permute.xlu1 %1004 }
 0x924   :  { %v1010_v56 = vsel %vm330_vm2, %v1005_v50, 0 }
 0x927   :  { %v1055_v55 = vpop.permute.xlu1 %1054 }
 0x928   :  { %v1863_v40 = vpop.eup %1862  ;;  %v1060_v58 = vsel %vm330_vm2, %v1055_v55, 0 }
 0x929   :  { %v887_v41 = vsel %vm330_vm2, %v1863_v40, 0.0 }
 0x92a   :  { %v1865_v43 = vpop.eup %1864  ;;  %888 = vadd.xlane.f32.xlu0 %v887_v41 }
 0x92b   :  { %v890_v44 = vsel %vm330_vm2, %v1865_v43, 0.0  ;;  %v1053_v60 = vpop.permute.xlu1 %1052 }
 0x92e   :  { %891 = vadd.xlane.f32.xlu0 %v890_v44  ;;  %v1831_v44 = vld [vmem:[#allocation12 + $0x8] sm:$0xff]  }
 0x944   :  { %899 = vrot.lane.b32.xlu0 %v2520_v39, %s2235_s15 }
 0x948   :  { %1002 = vrot.lane.b32.xlu0 %v2520_v39, %s2237_s20 }
 0x9b7   :  { %v889_v45 = vpop.xlane.xlu0 %888 }
 0x9b8   :  { %1866 = vrcp.f32 %v889_v45 }
 0x9bb   :  { %v892_v46 = vpop.xlane.xlu0 %891 }
 0x9bc   :  { %1868 = vrcp.f32 %v892_v46 }
 0x9bf   :  { %v900_v47 = vpop.permute.xlu0 %899 }
 0x9c0   :  { %v905_v48 = vsel %vm454_vm3, %v900_v47, 0 }
 0x9c1   :  { %1725 = vmatpush3.bf16.msra.mxu1 %v905_v48 }
 0x9c2   :  { %v1867_v49 = vpop.eup %1866  ;;  %1736 = vmatprep.subr.bf16.mxu1 %v2227_v15 }
 0x9c3   :  { %v895_v51 = vmul.f32 %v1867_v49, %v1863_v40  ;;  %v1003_v59 = vpop.permute.xlu0 %1002 }
 0x9c5   :  { %v897_v52 = vpack.c.bf16 %v895_v51, %v895_v51 }
 0x9c6   :  { %v1869_v53 = vpop.eup %1868 }
 0x9c7   :  { %v896_v54 = vmul.f32 %v1869_v53, %v1865_v43  ;;  %1727 = vmatmul.mubr.msk.bf16.vlgmr.msra.gmra.mrb[16].mxu1 %vm330_vm2, %v897_v52  ;;  %v1830_v43 = vld [vmem:[#allocation12] sm:$0xff]  }
 0x9c8   :  { %1738 = vmatprep.mubr.msk.bf16.mxu1 %vm2228_vm1, %v2227_v15 }
 0x9c9   :  { %v898_v57 = vpack.c.bf16 %v896_v54, %v896_v54 }
 0x9ca   :  { %1737 = vmatpush3.bf16.xpose.msra.mxu1 %v1010_v56  ;;  %v1585_v56 = vld [vmem:[#allocation14] ss:$0 sm:$0xff] }
 0x9cb   :  { %1733 = vmatmul.mubr.msk.bf16.vlgmr.msra.gmra.mrb[28].mxu0 %vm330_vm2, %v898_v57  ;;  %1748 = vmatprep.subr.bf16.mxu1 %v2227_v15 }
 0x9cc   :  { %1743 = vmatpush3.bf16.xpose.msra.mxu0 %v1060_v58  ;;  %1744 = vmatprep.mubr.msk.bf16.mxu0 %vm2228_vm1, %v2227_v15 }
 0x9cd   :  { %1754 = vmatprep.subr.bf16.mxu0 %v2227_v15 }
 0x9d1   :  { %1739 = vmatmul.mubr.msk.bf16.vlgmr.msra.gmra.mrb[20].mxu1 %vm330_vm2, %v1003_v59 }
 0x9d2   :  { %1750 = vmatprep.mubr.msk.bf16.mxu1 %vm2228_vm1, %v2227_v15 }
 0x9d3   :  { %1745 = vmatmul.mubr.msk.bf16.vlgmr.msra.gmra.mrb[32].mxu0 %vm330_vm2, %v1053_v60 }
 0x9d4   :  { %1756 = vmatprep.mubr.msk.bf16.mxu0 %vm2228_vm1, %v2227_v15 }
 0xa9a   :  { %v941_v61 = vpop.f32.mrb[16].mxu1 }
 0xa9b   :  { %v1728_v62 = vpop.f32.mrb[17].mxu1 }
 0xa9c   :  { %v944_v63 = vpop.f32.mrb[18].mxu1 }
 0xa9d   :  { %v1729_v2 = vpop.f32.mrb[19].mxu1 }
 0xa9e   :  { %v989_v3 = vpop.f32.mrb[28].mxu0 }
 0xa9f   :  { %v995_v4 = vpack.c.bf16 %v989_v3, %v941_v61  ;;  %v1734_v5 = vpop.f32.mrb[29].mxu0 }
 0xaa0   :  { %v992_v6 = vpop.f32.mrb[30].mxu0 }
 0xaa1   :  { %v1735_v7 = vpop.f32.mrb[31].mxu0 }
 0xaa4   :  { %v1046_v8 = vpop.f32.mrb[20].mxu1 }
 0xaa5   :  { %v1740_v9 = vpop.f32.mrb[21].mxu1  ;;  %v1102_v10 = vsel %vm330_vm2, %v1046_v8, -inf }
 0xaa6   :  { %1103 = vmax.xlane.f32.xlu0 %v1102_v10  ;;  %v1049_v12 = vpop.f32.mrb[22].mxu1  ;;  %v1096_v13 = vpop.f32.mrb[32].mxu0 }
 0xaa7   :  { %v1741_v14 = vpop.f32.mrb[23].mxu1  ;;  %v1746_v18 = vpop.f32.mrb[33].mxu0  ;;  %v1105_v19 = vsel %vm330_vm2, %v1096_v13, -inf }
 0xaa8   :  { %1106 = vmax.xlane.f32.xlu1 %v1105_v19  ;;  %v1099_v20 = vpop.f32.mrb[34].mxu0  ;;  %v1832_v14 = vld [vmem:[#allocation18] sm:$0xff]   ;;  %v1833_v18 = vld [vmem:[#allocation18 + $0x8] sm:$0xff]   ;;  %v1834_v19 = vld [vmem:[#allocation21] sm:$0xff]  }
 0xaa9   :  { %v1747_v21 = vpop.f32.mrb[35].mxu0  ;;  %v1835_v20 = vld [vmem:[#allocation21 + $0x8] sm:$0xff]  }
 0xab9   :  { %1174 = vrot.lane.b32.xlu1 %v2522_v42, %s2238_s7 }
 0xabd   :  { %770 = vrot.lane.b32.xlu1 %v768_v17, %s2220_s26 }
 0xac1   :  { %997 = vrot.lane.b32.xlu1 %v995_v4, %s2239_s4 }
 0xb33   :  { %v1104_v22 = vpop.xlane.xlu0 %1103 }
 0xb34   :  { %v1108_v23 = vsub.f32 %v1046_v8, %v1104_v22 }
 0xb35   :  { %v1107_v24 = vpop.xlane.xlu1 %1106 }
 0xb36   :  { %v1110_v25 = vmul.f32 1.442695, %v1108_v23  ;;  %v1109_v26 = vsub.f32 %v1096_v13, %v1107_v24 }
 0xb38   :  { %1870 = vpow2.f32 %v1110_v25  ;;  %v1112_v27 = vmul.f32 1.442695, %v1109_v26 }
 0xb39   :  { %v1175_v28 = vpop.permute.xlu1 %1174 }
 0xb3a   :  { %1872 = vpow2.f32 %v1112_v27  ;;  %v1180_v29 = vsel %vm454_vm3, %v1175_v28, 0 }
 0xb3b   :  { %1755 = vmatpush3.bf16.msra.mxu0 %v1180_v29  ;;  %v1589_v29 = vld [vmem:[#allocation15] ss:$0 sm:$0xff] }
 0xb3c   :  { %1768 = vmatprep.subr.bf16.mxu0 %v2227_v15 }
 0xb3d   :  { %v771_v42 = vpop.permute.xlu1 %770 }
 0xb3e   :  { %774 = vst.msk [vmem:[#allocation2] sm:$0xff] %vm773_vm4, %v771_v42 }
 0xb41   :  { %v998_v11 = vpop.permute.xlu1 %997 }
 0xb42   :  { %v1871_v16 = vpop.eup %1870  ;;  %1001 = vst.msk [vmem:[#allocation2] sm:$0xff] %vm1000_vm5, %v998_v11 }
 0xb43   :  { %v1114_v17 = vsel %vm330_vm2, %v1871_v16, 0.0 }
 0xb44   :  { %v1873_v30 = vpop.eup %1872  ;;  %1115 = vadd.xlane.f32.xlu0 %v1114_v17  ;;  %v1590_v17 = vld [vmem:[#allocation17] ss:$0 sm:$0xff] }
 0xb45   :  { %v1117_v31 = vsel %vm330_vm2, %v1873_v30, 0.0 }
 0xb48   :  { %1118 = vadd.xlane.f32.xlu0 %v1117_v31 }
 0xb5e   :  { %1126 = vrot.lane.b32.xlu0 %v2520_v39, %s2238_s7 }
 0xbd1   :  { %v1116_v32 = vpop.xlane.xlu0 %1115 }
 0xbd2   :  { %1874 = vrcp.f32 %v1116_v32 }
 0xbd5   :  { %v1119_v33 = vpop.xlane.xlu0 %1118 }
 0xbd6   :  { %1876 = vrcp.f32 %v1119_v33 }
 0xbd9   :  { %v1127_v34 = vpop.permute.xlu0 %1126 }
 0xbda   :  { %v1132_v35 = vsel %vm454_vm3, %v1127_v34, 0  ;;  %v1836_v34 = vld [vmem:[#allocation21 + $0x10] sm:$0xff]  }
 0xbdb   :  { %1749 = vmatpush3.bf16.msra.mxu1 %v1132_v35  ;;  %v1837_v35 = vld [vmem:[#allocation21 + $0x18] sm:$0xff]  }
 0xbdc   :  { %v1875_v36 = vpop.eup %1874  ;;  %1760 = vmatprep.subr.bf16.mxu1 %v2227_v15 }
 0xbdd   :  { %v1122_v37 = vmul.f32 %v1875_v36, %v1871_v16  ;;  %v1838_v36 = vld [vmem:[#allocation21 + $0x20] sm:$0xff]  }
 0xbdf   :  { %v1124_v38 = vpack.c.bf16 %v1122_v37, %v1122_v37  ;;  %v1839_v37 = vld [vmem:[#allocation21 + $0x28] sm:$0xff]  }
 0xbe0   :  { %v1877_v40 = vpop.eup %1876 }
 0xbe1   :  { %v1123_v41 = vmul.f32 %v1877_v40, %v1873_v30  ;;  %1751 = vmatmul.mubr.msk.bf16.vlgmr.msra.gmra.mrb[24].mxu1 %vm330_vm2, %v1124_v38  ;;  %v1840_v38 = vld [vmem:[#allocation21 + $0x30] sm:$0xff]   ;;  %v1841_v40 = vld [vmem:[#allocation21 + $0x38] sm:$0xff]  }
 0xbe2   :  { %1764 = vmatprep.mubr.msk.bf16.mxu1 %vm2228_vm1, %v2227_v15  ;;  %1761 = vmatpush3.bf16.msra.mxu1 %v1830_v43 }
 0xbe3   :  { %v1125_v39 = vpack.c.bf16 %v1123_v41, %v1123_v41  ;;  %1762 = vmatprep.subr.bf16.mxu1 %v2227_v15  ;;  %v1591_v41 = vld [vmem:[#allocation20] ss:$0 sm:$0xff] }
 0xbe5   :  { %1757 = vmatmul.mubr.msk.bf16.vlgmr.msra.gmra.mrb[36].mxu0 %vm330_vm2, %v1125_v39 }
 0xbe6   :  { %1772 = vmatprep.mubr.msk.bf16.mxu0 %vm2228_vm1, %v2227_v15  ;;  %1763 = vmatpush3.bf16.msra.mxu1 %v1831_v44 }
 0xbe7   :  { %1776 = vmatprep.subr.bf16.mxu1 %v2227_v15  ;;  %1769 = vmatpush3.bf16.msra.mxu0 %v1832_v14 }
 0xbe8   :  { %1770 = vmatprep.subr.bf16.mxu0 %v2227_v15 }
 0xbeb   :  { %1771 = vmatpush3.bf16.msra.mxu0 %v1833_v18 }
 0xcb4   :  { %v1168_v45 = vpop.f32.mrb[24].mxu1 }
 0xcb5   :  { %v1752_v46 = vpop.f32.mrb[25].mxu1 }
 0xcb6   :  { %v1171_v47 = vpop.f32.mrb[26].mxu1 }
 0xcb7   :  { %v1753_v48 = vpop.f32.mrb[27].mxu1 }
 0xcb8   :  { %v1216_v49 = vpop.f32.mrb[36].mxu0 }
 0xcb9   :  { %v1222_v50 = vpack.c.bf16 %v1216_v49, %v1168_v45  ;;  %v1758_v51 = vpop.f32.mrb[37].mxu0 }
 0xcba   :  { %v1219_v52 = vpop.f32.mrb[38].mxu0 }
 0xcbb   :  { %1224 = vrot.lane.b32.xlu0 %v1222_v50, %s2240_s27  ;;  %v1759_v53 = vpop.f32.mrb[39].mxu0 }
 0xd2d   :  { %v1225_v54 = vpop.permute.xlu0 %1224 }
 0xd2e   :  { %1228 = vst.msk [vmem:[#allocation2] sm:$0xff] %vm1227_vm6, %v1225_v54 }
 0xd35   :  { %v1229_v55 = vld [vmem:[#allocation2] sm:$0xff] }
 0xd36   :  { %1765 = vmatmul.mubr.msk.bf16.vlgmr.msra.gmra.mrb[28].mxu1 %vm210_vm0, %v1229_v55 }
 0xd37   :  { %1792 = vmatprep.mubr.msk.bf16.mxu1 %vm2228_vm1, %v2227_v15  ;;  %1777 = vmatpush3.bf16.msra.mxu1 %v1834_v19 }
 0xd38   :  { %1778 = vmatprep.subr.bf16.mxu1 %v2227_v15 }
 0xd3b   :  { %1779 = vmatpush3.bf16.msra.mxu1 %v1835_v20 }
 0xd3c   :  { %1780 = vmatprep.subr.bf16.mxu1 %v2227_v15 }
 0xd3f   :  { %1781 = vmatpush3.bf16.msra.mxu1 %v1836_v34 }
 0xd40   :  { %1782 = vmatprep.subr.bf16.mxu1 %v2227_v15 }
 0xd43   :  { %1783 = vmatpush3.bf16.msra.mxu1 %v1837_v35 }
 0xd44   :  { %1784 = vmatprep.subr.bf16.mxu1 %v2227_v15 }
 0xd47   :  { %1785 = vmatpush3.bf16.msra.mxu1 %v1838_v36 }
 0xd48   :  { %1786 = vmatprep.subr.bf16.mxu1 %v2227_v15 }
 0xd4b   :  { %1787 = vmatpush3.bf16.msra.mxu1 %v1839_v37 }
 0xd4c   :  { %1788 = vmatprep.subr.bf16.mxu1 %v2227_v15 }
 0xd4f   :  { %1789 = vmatpush3.bf16.msra.mxu1 %v1840_v38 }
 0xd50   :  { %1790 = vmatprep.subr.bf16.mxu1 %v2227_v15 }
 0xd53   :  { %1791 = vmatpush3.bf16.msra.mxu1 %v1841_v40 }
 0xe09   :  { %v1290_v57 = vpop.f32.mrb[28].mxu1 }
 0xe0a   :  { %v1291_v58 = vadd.f32 %v1585_v56, %v1290_v57  ;;  %v1766_v59 = vpop.f32.mrb[29].mxu1 }
 0xe0b   :  { %v1293_v60 = vpop.f32.mrb[30].mxu1 }
 0xe0c   :  { %v2663_v61 = vadd.f32 %v1291_v58, %v2497_v0  ;;  %v1294_v62 = vadd.f32 %v1585_v56, %v1293_v60  ;;  %v1767_v63 = vpop.f32.mrb[31].mxu1  ;;  %v1595_v58 = vld [vmem:[#allocation23] ss:$0 sm:$0xff] }
 0xe0e   :  { %v2666_v2 = vadd.f32 %v1294_v62, %v2499_v1  ;;  %v1301_v3 = vsel %vm210_vm0, %v2663_v61, 0.0 }
 0xe0f   :  { %1302 = vadd.xlane.f32.xlu1 %v1301_v3 }
 0xe10   :  { %v1304_v4 = vsel %vm210_vm0, %v2666_v2, 0.0 }
 0xe11   :  { %1305 = vadd.xlane.f32.xlu0 %v1304_v4 }
 0xe9c   :  { %v1303_v5 = vpop.xlane.xlu1 %1302 }
 0xe9d   :  { %v1307_v6 = vmul.f32 0.03125, %v1303_v5 }
 0xe9e   :  { %v1306_v7 = vpop.xlane.xlu0 %1305 }
 0xe9f   :  { %v1309_v8 = vsub.f32 %v2663_v61, %v1307_v6  ;;  %v1308_v0 = vmul.f32 0.03125, %v1306_v7 }
 0xea1   :  { %v1310_v9 = vsub.f32 %v2666_v2, %v1308_v0  ;;  %v1311_v10 = vmul.f32 %v1309_v8, %v1309_v8 }
 0xea3   :  { %v1313_v1 = vsel %vm210_vm0, %v1311_v10, 0.0  ;;  %v1312_v12 = vmul.f32 %v1310_v9, %v1310_v9 }
 0xea4   :  { %1314 = vadd.xlane.f32.xlu0 %v1313_v1 }
 0xea5   :  { %v1316_v13 = vsel %vm210_vm0, %v1312_v12, 0.0 }
 0xea8   :  { %1317 = vadd.xlane.f32.xlu0 %v1316_v13 }
 0xf31   :  { %v1315_v21 = vpop.xlane.xlu0 %1314 }
 0xf32   :  { %v1319_v22 = vmul.f32 0.03125, %v1315_v21 }
 0xf34   :  { %v1321_v23 = vadd.f32 1e-05, %v1319_v22 }
 0xf35   :  { %v1318_v24 = vpop.xlane.xlu0 %1317 }
 0xf36   :  { %1878 = vrsqrt.f32 %v1321_v23  ;;  %v1320_v25 = vmul.f32 0.03125, %v1318_v24 }
 0xf38   :  { %v1322_v26 = vadd.f32 1e-05, %v1320_v25 }
 0xf3a   :  { %1880 = vrsqrt.f32 %v1322_v26 }
 0xf40   :  { %v1879_v27 = vpop.eup %1878 }
 0xf41   :  { %v1325_v28 = vmul.f32 %v1879_v27, %v1309_v8 }
 0xf43   :  { %v1333_v11 = vmul.f32 %v1589_v29, %v1325_v28 }
 0xf44   :  { %v1881_v42 = vpop.eup %1880 }
 0xf45   :  { %v1326_v16 = vmul.f32 %v1881_v42, %v1310_v9  ;;  %v1341_v31 = vadd.f32 %v1590_v17, %v1333_v11 }
 0xf47   :  { %v1334_v30 = vmul.f32 %v1589_v29, %v1326_v16 }
 0xf49   :  { %v1342_v32 = vadd.f32 %v1590_v17, %v1334_v30 }
 0xf4b   :  { %v1343_v33 = vpack.c.bf16 %v1342_v32, %v1341_v31 }
 0xf4d   :  { %1773 = vmatmul.mubr.msk.bf16.vlgmr.msra.gmra.mrb[40].mxu0 %vm210_vm0, %v1343_v33 }
0x1020   :  { %v1404_v39 = vpop.f32.mrb[40].mxu0 }
0x1021   :  { %v1405_v43 = vadd.f32 %v1591_v41, %v1404_v39  ;;  %v1774_v44 = vpop.f32.mrb[41].mxu0 }
0x1022   :  { %v1407_v45 = vpop.f32.mrb[42].mxu0 }
0x1023   :  { %v1413_v46 = vmul.f32 0.70710677, %v1405_v43  ;;  %v1408_v47 = vadd.f32 %v1591_v41, %v1407_v45  ;;  %v1775_v48 = vpop.f32.mrb[43].mxu0  ;;  %v1411_v53 = vmul.f32 0.5, %v1405_v43 }
0x1025   :  { %1882 = verf.f32 %v1413_v46  ;;  %v1414_v49 = vmul.f32 0.70710677, %v1408_v47  ;;  %v1412_v54 = vmul.f32 0.5, %v1408_v47 }
0x1027   :  { %1884 = verf.f32 %v1414_v49 }
0x102f   :  { %v1883_v50 = vpop.eup %1882 }
0x1030   :  { %v1417_v51 = vadd.f32 1.0, %v1883_v50 }
0x1031   :  { %v1885_v52 = vpop.eup %1884 }
0x1032   :  { %v1418_v55 = vadd.f32 1.0, %v1885_v52  ;;  %v1419_v15 = vmul.f32 %v1417_v51, %v1411_v53 }
0x1034   :  { %v1420_v56 = vmul.f32 %v1418_v55, %v1412_v54 }
0x1036   :  { %v1421_v57 = vpack.c.bf16 %v1420_v56, %v1419_v15 }
0x1038   :  { %1793 = vmatmul.mubr.bf16.vlgmr.msra.gmra.mrb[32].mxu1 %v1421_v57 }
0x110b   :  { %v1527_v59 = vpop.f32.mrb[32].mxu1 }
0x110c   :  { %v1528_v60 = vadd.f32 %v1595_v58, %v1527_v59  ;;  %v1794_v62 = vpop.f32.mrb[33].mxu1 }
0x110d   :  { %v1530_v63 = vpop.f32.mrb[34].mxu1 }
0x110e   :  { %v1534_v3 = vadd.f32 %v1528_v60, %v2663_v61  ;;  %v1531_v4 = vadd.f32 %v1595_v58, %v1530_v63  ;;  %v1795_v5 = vpop.f32.mrb[35].mxu1 }
0x1110   :  { %1536 = vst.msk [vmem:[#allocation24] sm:$0xff] %vm210_vm0, %v1534_v3  ;;  %v1535_v6 = vadd.f32 %v1531_v4, %v2666_v2 }
0x1112   :  { %1537 = vst.msk [vmem:[#allocation24 + $0x8] sm:$0xff] %vm210_vm0, %v1535_v6 }
0x1113   :  { %2183 = shalt.err (!%p2180_p10)
}
0x1114   :  { %s2184_s3 = scalar_lea.hbm %s2717_s13, 256 }
0x1115   :  { %p2185_p11 = scmp.ne.s32.totalorder %s2717_s13, %s2184_s3  ;;  %p2188_p12 = scmp.lt.u32.totalorder %s2184_s3, %s2717_s13 }
0x1117   :  { %p2190_p13 = pnand %p2188_p12, %p2185_p11 }
0x1119   :  { %2193 = shalt.err (!%p2190_p13)
}
0x111a   :  { %1549 = dma.vmem_to_hbm [thread:$0]  %s1544_s8, 256, %s2717_s13, [#allocation5], %s2219_s11, %s2219_s11, %s2220_s26  }
0x111b   :  { %2208 = dma.done.wait [#allocation5], 256  }
0x111c   :  { %2209 = vsyncadd [#allocation5], 4294967040 }
0x111d   :  { %1553 = vsyncpa [#allocation4], 1 }
0x111e   :  { %1554 = vsyncpa [#allocation7], 1 }
0x111f   :  { %1555 = vsyncpa [#allocation10], 1 }
0x1120   :  { %1556 = vsyncpa [#allocation13], 1 }
0x1121   :  { %1557 = vsyncpa [#allocation16], 1 }
0x1122   :  { %1558 = vsyncpa [#allocation19], 1 }
0x1123   :  { %1559 = vsyncpa [#allocation22], 1 }
0x1124   :  { %1560 = vsyncpa [#allocation5], 1 }

</bundles_post_ra>
